<compile_context>
chip_gen: v7x
topology: tpu7x:2x2x1
jax: 0.10.0
libtpu: 0.0.40
codegen_flags: <defaults>
</compile_context>

<pallas_src>
import functools

import jax
import jax.numpy as jnp
from jax.experimental import pallas as pl
from jax.experimental.pallas import tpu as pltpu

LANE = 128
MM_DTYPE = jnp.bfloat16          # MXU operand dtype (accumulation stays f32)


def _roundup(x, m):
    return ((x + m - 1) // m) * m


# ----------------------------------------------------------------------------
# Fused kernel: one-hot gather -> (conv+relu) x2 -> maxpool   (both branches)
#               -> concat -> FC -> ReLU -> (Dropout=id) -> FC
# ----------------------------------------------------------------------------
def _make_fused_kernel(batch, kernel_size, kernel_pad, s1, sb1, s2, sb2,
                       mm_dtype=MM_DTYPE):
    B, K, P = batch, kernel_size, kernel_pad

    def conv_relu(x, w_ref, b_ref):
        # x: (n, C) f32 slab holding all B sentences; gap rows are zero.
        n, c = x.shape
        xm = x.astype(mm_dtype)
        if P > 0:
            zp = jnp.zeros((P, c), mm_dtype)
            xm = jnp.concatenate([zp, xm, zp], axis=0)            # (n + 2P, C)
        # im2col packing: all K taps' real channels in one contraction
        # -> a SINGLE MXU matmul per conv layer per branch.
        cols = jnp.concatenate([xm[k:k + n, :] for k in range(K)], axis=1)
        ckp = w_ref.shape[0]                                      # roundup(K*C, 128)
        if ckp > K * c:
            cols = jnp.concatenate(
                [cols, jnp.zeros((n, ckp - K * c), mm_dtype)], axis=1)
        y = jnp.dot(cols, w_ref[...], preferred_element_type=jnp.float32)
        return jnp.maximum(y + b_ref[...], 0.0)                   # (n, Cout) f32

    def branch(ids_ref, mask_ref, emb_ref, w_a, b_a, w_b, b_b, S, SB):
        n = ids_ref.shape[0]                                      # B * SB
        vp = emb_ref.shape[0]
        # In-kernel embedding gather as a one-hot MXU matmul (gap ids == -1
        # select nothing -> zero rows).
        # TODO(synk): for large vocabularies replace the one-hot matmul with a
        # scalar-prefetched / DMA row gather.
        iota = jax.lax.broadcasted_iota(jnp.int32, (n, vp), 1)
        onehot = jnp.where(ids_ref[...] == iota, 1.0, 0.0).astype(mm_dtype)
        e = jnp.dot(onehot, emb_ref[...], preferred_element_type=jnp.float32)
        h = conv_relu(e, w_a, b_a)
        h = h * mask_ref[...]       # zero inter-sentence gap rows ("same" pad)
        h = conv_relu(h, w_b, b_b)
        # MaxPool1d over the full (max) sentence length, per sentence.
        return jnp.concatenate(
            [jnp.max(h[b * SB:b * SB + S, :], axis=0, keepdims=True)
             for b in range(B)], axis=0)                          # (B, Cout)

    def kernel(ids1_ref, ids2_ref, mask1_ref, mask2_ref, emb_ref,
               w11_ref, b11_ref, w12_ref, b12_ref,
               w21_ref, b21_ref, w22_ref, b22_ref,
               wfc1_ref, bfc1_ref, wfc2_ref, bfc2_ref,
               o_ref):
        p1 = branch(ids1_ref, mask1_ref, emb_ref,
                    w11_ref, b11_ref, w12_ref, b12_ref, s1, sb1)
        p2 = branch(ids2_ref, mask2_ref, emb_ref,
                    w21_ref, b21_ref, w22_ref, b22_ref, s2, sb2)
        feat = jnp.concatenate([p1, p2], axis=1)                  # (B, H1+H2)
        hid = jnp.maximum(
            jnp.dot(feat.astype(mm_dtype), wfc1_ref[...],
                    preferred_element_type=jnp.float32) + bfc1_ref[...], 0.0)
        # TODO(synk): nn.Dropout is identity in eval mode; no dropout applied.
        o_ref[...] = (jnp.dot(hid.astype(mm_dtype), wfc2_ref[...],
                              preferred_element_type=jnp.float32)
                      + bfc2_ref[...])              # lane-dense (B, 128) store

    return kernel


# ----------------------------------------------------------------------------
# One-time parameter preparation: im2col-flatten conv weights, bf16 operands
# ----------------------------------------------------------------------------
def prepare_params(params, mm_dtype=MM_DTYPE):
    def conv_w(w):            # (K, Cin, Cout) -> (roundup(K*Cin, 128), Cout)
        K, cin, cout = w.shape
        flat = w.astype(jnp.float32).reshape(K * cin, cout)
        rows = _roundup(K * cin, LANE)
        out = jnp.zeros((rows, cout), jnp.float32).at[:K * cin, :].set(flat)
        return out.astype(mm_dtype)

    def bias_row(b):          # (C,) -> (1, C) f32 (bias/ReLU stay in f32)
        return b.astype(jnp.float32).reshape(1, -1)

    emb = params["emb"].astype(jnp.float32)
    vocab = emb.shape[0]
    vp = _roundup(vocab, LANE)
    emb_p = jnp.zeros((vp, emb.shape[1]), jnp.float32).at[:vocab].set(emb)

    wfc2 = params["wfc2"].astype(jnp.float32)
    fc, nc = wfc2.shape
    wfc2_p = jnp.zeros((fc, LANE), jnp.float32).at[:, :nc].set(wfc2)
    bfc2_p = jnp.zeros((1, LANE), jnp.float32).at[0, :nc].set(
        params["bfc2"].astype(jnp.float32))

    return {
        "emb": emb_p.astype(mm_dtype),
        "w11": conv_w(params["w1_1"]), "b11": bias_row(params["b1_1"]),
        "w12": conv_w(params["w1_2"]), "b12": bias_row(params["b1_2"]),
        "w21": conv_w(params["w2_1"]), "b21": bias_row(params["b2_1"]),
        "w22": conv_w(params["w2_2"]), "b22": bias_row(params["b2_2"]),
        "wfc1": params["wfc1"].astype(mm_dtype),   # (H1+H2, FC)
        "bfc1": bias_row(params["bfc1"]),
        "wfc2": wfc2_p.astype(mm_dtype),           # (FC, 128) lane-padded
        "bfc2": bfc2_p,                            # (1, 128)
    }


# ----------------------------------------------------------------------------
# Full CNN_Encoder forward (single device program: one fused Pallas launch)
# ----------------------------------------------------------------------------
def _core_ids(x, sb):
    # (B, S) token ids -> (B*sb, 1) slab ids; gap rows get id -1 (-> zero emb).
    b, s = x.shape
    fill = jnp.full((b, sb - s), -1, jnp.int32)
    return jnp.concatenate([x.astype(jnp.int32), fill], axis=1).reshape(b * sb, 1)


def _gap_mask(batch, s, sb):
    m = (jnp.arange(sb) < s).astype(jnp.float32)
    return jnp.tile(m, (batch,)).reshape(batch * sb, 1)


@functools.partial(jax.jit,
                   static_argnames=("kernel_size", "kernel_pad", "num_classes"))
def cnn_encoder_forward(pp, x1, lengths1, x2, lengths2, *,
                        kernel_size, kernel_pad, num_classes):
    del lengths1, lengths2          # the PyTorch forward ignores them as well
    assert 2 * kernel_pad == kernel_size - 1, "module implies 'same' conv"
    B, S1 = x1.shape
    B2, S2 = x2.shape
    assert B == B2
    # Per-sentence slab: S data rows + >=P zero gap rows, 8-sublane aligned.
    SB1 = _roundup(S1 + kernel_pad, 8)
    SB2 = _roundup(S2 + kernel_pad, 8)

    ids1 = _core_ids(x1, SB1)
    ids2 = _core_ids(x2, SB2)
    m1 = _gap_mask(B, S1, SB1)
    m2 = _gap_mask(B, S2, SB2)

    kernel = _make_fused_kernel(B, kernel_size, kernel_pad, S1, SB1, S2, SB2)
    n_inputs = 17
    # TODO(synk): on v7x a branch/batch-parallel grid could use the second
    # TensorCore; skipped while the workload is launch-bound (neutral v5e/v6e).
    out = pl.pallas_call(
        kernel,
        out_shape=jax.ShapeDtypeStruct((B, LANE), jnp.float32),
        in_specs=[pl.BlockSpec(memory_space=pltpu.MemorySpace.VMEM)] * n_inputs,
        out_specs=pl.BlockSpec(memory_space=pltpu.MemorySpace.VMEM),
        compiler_params=pltpu.CompilerParams(vmem_limit_bytes=32 * 1024 * 1024),
    )(ids1, ids2, m1, m2, pp["emb"],
      pp["w11"], pp["b11"], pp["w12"], pp["b12"],
      pp["w21"], pp["b21"], pp["w22"], pp["b22"],
      pp["wfc1"], pp["bfc1"], pp["wfc2"], pp["bfc2"])
    return out[:, :num_classes]     # lane-dense (B, 128) store; slice outside


# ----------------------------------------------------------------------------
# Pure-JAX f32 reference (same math, no Pallas) for a correctness cross-check
# ----------------------------------------------------------------------------
def _ref_conv_relu(x, w, b, pad):
    xpad = jnp.pad(x, ((0, 0), (pad, pad), (0, 0)))
    K = w.shape[0]
    S = x.shape[1] + 2 * pad - K + 1
    acc = sum(jnp.einsum("bsc,cd->bsd", xpad[:, k:k + S, :], w[k])
              for k in range(K))
    return jnp.maximum(acc + b, 0.0)


def _ref_forward(params, x1, x2, pad):
    e1 = params["emb"][x1]
    e2 = params["emb"][x2]
    h1 = _ref_conv_relu(e1, params["w1_1"], params["b1_1"], pad)
    h1 = _ref_conv_relu(h1, params["w1_2"], params["b1_2"], pad)
    h2 = _ref_conv_relu(e2, params["w2_1"], params["b2_1"], pad)
    h2 = _ref_conv_relu(h2, params["w2_2"], params["b2_2"], pad)
    feat = jnp.concatenate([jnp.max(h1, axis=1), jnp.max(h2, axis=1)], axis=-1)
    hid = jnp.maximum(feat @ params["wfc1"] + params["bfc1"], 0.0)
    return hid @ params["wfc2"] + params["bfc2"]


if __name__ == "__main__":
    # Small shapes consistent with the module's forward.
    VOCAB = 50
    EMB = 32                 # emb_size
    H1, H2 = 32, 32          # hidden_size = (hidden_size1, hidden_size2)
    FC_DIM = 32
    NUM_CLASSES = 3
    KERNEL_SIZE, KERNEL_PAD = 3, 1
    B = 2
    S1 = 16                  # MAX_SENTENCE1_LENGTH
    S2 = 12                  # MAX_SENTENCE2_LENGTH

    key = jax.random.PRNGKey(0)
    ks = jax.random.split(key, 16)
    sc = 0.1
    params = {
        "emb":  jax.random.normal(ks[0], (VOCAB, EMB), jnp.float32),
        "w1_1": sc * jax.random.normal(ks[1], (KERNEL_SIZE, EMB, H1), jnp.float32),
        "b1_1": sc * jax.random.normal(ks[2], (H1,), jnp.float32),
        "w1_2": sc * jax.random.normal(ks[3], (KERNEL_SIZE, H1, H1), jnp.float32),
        "b1_2": sc * jax.random.normal(ks[4], (H1,), jnp.float32),
        "w2_1": sc * jax.random.normal(ks[5], (KERNEL_SIZE, EMB, H2), jnp.float32),
        "b2_1": sc * jax.random.normal(ks[6], (H2,), jnp.float32),
        "w2_2": sc * jax.random.normal(ks[7], (KERNEL_SIZE, H2, H2), jnp.float32),
        "b2_2": sc * jax.random.normal(ks[8], (H2,), jnp.float32),
        "wfc1": sc * jax.random.normal(ks[9], (H1 + H2, FC_DIM), jnp.float32),
        "bfc1": sc * jax.random.normal(ks[10], (FC_DIM,), jnp.float32),
        "wfc2": sc * jax.random.normal(ks[11], (FC_DIM, NUM_CLASSES), jnp.float32),
        "bfc2": sc * jax.random.normal(ks[12], (NUM_CLASSES,), jnp.float32),
    }

    x1 = jax.random.randint(ks[13], (B, S1), 0, VOCAB, dtype=jnp.int32)
    x2 = jax.random.randint(ks[14], (B, S2), 0, VOCAB, dtype=jnp.int32)
    lengths1 = jnp.full((B,), S1, dtype=jnp.int32)
    lengths2 = jnp.full((B,), S2, dtype=jnp.int32)

    padded = prepare_params(params)
    logits = cnn_encoder_forward(padded, x1, lengths1, x2, lengths2,
                                 kernel_size=KERNEL_SIZE,
                                 kernel_pad=KERNEL_PAD,
                                 num_classes=NUM_CLASSES)
    logits = jax.block_until_ready(logits)

    ref = _ref_forward(params, x1, x2, KERNEL_PAD)
    assert logits.shape == (B, NUM_CLASSES)
    # bf16 MXU operands (f32 accumulate) -> loosened tolerance vs f32 reference.
    assert jnp.allclose(logits, ref, atol=5e-2, rtol=5e-2), (logits, ref)

    print("KERNEL_OK")
</pallas_src>

<mosaic_0001>
module attributes {stable_mosaic.version = 11 : i64} {
  func.func @kernel(%arg0: memref<48x1xi32, #tpu.memory_space<vmem>>, %arg1: memref<32x1xi32, #tpu.memory_space<vmem>>, %arg2: memref<48x1xf32, #tpu.memory_space<vmem>>, %arg3: memref<32x1xf32, #tpu.memory_space<vmem>>, %arg4: memref<128x32xbf16, #tpu.memory_space<vmem>>, %arg5: memref<128x32xbf16, #tpu.memory_space<vmem>>, %arg6: memref<1x32xf32, #tpu.memory_space<vmem>>, %arg7: memref<128x32xbf16, #tpu.memory_space<vmem>>, %arg8: memref<1x32xf32, #tpu.memory_space<vmem>>, %arg9: memref<128x32xbf16, #tpu.memory_space<vmem>>, %arg10: memref<1x32xf32, #tpu.memory_space<vmem>>, %arg11: memref<128x32xbf16, #tpu.memory_space<vmem>>, %arg12: memref<1x32xf32, #tpu.memory_space<vmem>>, %arg13: memref<64x32xbf16, #tpu.memory_space<vmem>>, %arg14: memref<1x32xf32, #tpu.memory_space<vmem>>, %arg15: memref<32x128xbf16, #tpu.memory_space<vmem>>, %arg16: memref<1x128xf32, #tpu.memory_space<vmem>>, %arg17: memref<2x128xf32, #tpu.memory_space<vmem>>) attributes {dimension_semantics = [], scalar_prefetch = 0 : i64, scratch_operands = 0 : i64, tpu.core_type = #tpu.core_type<tc>} {
    %0 = tpu.iota {dimensions = array<i32: 1>} : vector<48x128xi32>
    %c0 = arith.constant 0 : index
    %c0_0 = arith.constant 0 : index
    %1 = vector.load %arg0[%c0, %c0_0] : memref<48x1xi32, #tpu.memory_space<vmem>>, vector<48x1xi32>
    %2 = vector.broadcast %1 : vector<48x1xi32> to vector<48x128xi32>
    %3 = arith.cmpi eq, %2, %0 : vector<48x128xi32>
    %cst = arith.constant 1.000000e+00 : f32
    %cst_1 = arith.constant 0.000000e+00 : f32
    %4 = vector.broadcast %cst : f32 to vector<48x128xf32>
    %5 = vector.broadcast %cst_1 : f32 to vector<48x128xf32>
    %6 = arith.select %3, %4, %5 : vector<48x128xi1>, vector<48x128xf32>
    %7 = arith.truncf %6 : vector<48x128xf32> to vector<48x128xbf16>
    %c0_2 = arith.constant 0 : index
    %c0_3 = arith.constant 0 : index
    %8 = vector.load %arg4[%c0_2, %c0_3] : memref<128x32xbf16, #tpu.memory_space<vmem>>, vector<128x32xbf16>
    %cst_4 = arith.constant dense<0.000000e+00> : vector<48x32xf32>
    %9 = tpu.matmul %7, %8, %cst_4 {dimension_numbers = #tpu.dot_dimension_numbers<[1], [0], [0], [1], [0, 0, 1, 1], [], []>} : vector<48x128xbf16>, vector<128x32xbf16>, vector<48x32xf32> -> vector<48x32xf32>
    %10 = arith.truncf %9 : vector<48x32xf32> to vector<48x32xbf16>
    %cst_5 = arith.constant 0.000000e+00 : bf16
    %11 = vector.broadcast %cst_5 : bf16 to vector<1x32xbf16>
    %12 = tpu.concatenate %11, %10, %11 in 0 : vector<1x32xbf16>, vector<48x32xbf16>, vector<1x32xbf16> -> vector<50x32xbf16>
    %13 = vector.extract_strided_slice %12 {offsets = [0, 0], sizes = [48, 32], strides = [1, 1]} : vector<50x32xbf16> to vector<48x32xbf16>
    %14 = vector.extract_strided_slice %12 {offsets = [1, 0], sizes = [48, 32], strides = [1, 1]} : vector<50x32xbf16> to vector<48x32xbf16>
    %15 = vector.extract_strided_slice %12 {offsets = [2, 0], sizes = [48, 32], strides = [1, 1]} : vector<50x32xbf16> to vector<48x32xbf16>
    %16 = tpu.concatenate %13, %14, %15 in 1 : vector<48x32xbf16>, vector<48x32xbf16>, vector<48x32xbf16> -> vector<48x96xbf16>
    %cst_6 = arith.constant 0.000000e+00 : bf16
    %17 = vector.broadcast %cst_6 : bf16 to vector<48x32xbf16>
    %18 = tpu.concatenate %16, %17 in 1 : vector<48x96xbf16>, vector<48x32xbf16> -> vector<48x128xbf16>
    %c0_7 = arith.constant 0 : index
    %c0_8 = arith.constant 0 : index
    %19 = vector.load %arg5[%c0_7, %c0_8] : memref<128x32xbf16, #tpu.memory_space<vmem>>, vector<128x32xbf16>
    %cst_9 = arith.constant dense<0.000000e+00> : vector<48x32xf32>
    %20 = tpu.matmul %18, %19, %cst_9 {dimension_numbers = #tpu.dot_dimension_numbers<[1], [0], [0], [1], [0, 0, 1, 1], [], []>} : vector<48x128xbf16>, vector<128x32xbf16>, vector<48x32xf32> -> vector<48x32xf32>
    %c0_10 = arith.constant 0 : index
    %c0_11 = arith.constant 0 : index
    %21 = vector.load %arg6[%c0_10, %c0_11] : memref<1x32xf32, #tpu.memory_space<vmem>>, vector<1x32xf32>
    %22 = vector.broadcast %21 : vector<1x32xf32> to vector<48x32xf32>
    %23 = arith.addf %20, %22 : vector<48x32xf32>
    %cst_12 = arith.constant 0.000000e+00 : f32
    %24 = vector.broadcast %cst_12 : f32 to vector<48x32xf32>
    %25 = arith.maximumf %23, %24 : vector<48x32xf32>
    %c0_13 = arith.constant 0 : index
    %c0_14 = arith.constant 0 : index
    %26 = vector.load %arg2[%c0_13, %c0_14] : memref<48x1xf32, #tpu.memory_space<vmem>>, vector<48x1xf32>
    %27 = vector.broadcast %26 : vector<48x1xf32> to vector<48x32xf32>
    %28 = arith.mulf %25, %27 : vector<48x32xf32>
    %29 = arith.truncf %28 : vector<48x32xf32> to vector<48x32xbf16>
    %cst_15 = arith.constant 0.000000e+00 : bf16
    %30 = vector.broadcast %cst_15 : bf16 to vector<1x32xbf16>
    %31 = tpu.concatenate %30, %29, %30 in 0 : vector<1x32xbf16>, vector<48x32xbf16>, vector<1x32xbf16> -> vector<50x32xbf16>
    %32 = vector.extract_strided_slice %31 {offsets = [0, 0], sizes = [48, 32], strides = [1, 1]} : vector<50x32xbf16> to vector<48x32xbf16>
    %33 = vector.extract_strided_slice %31 {offsets = [1, 0], sizes = [48, 32], strides = [1, 1]} : vector<50x32xbf16> to vector<48x32xbf16>
    %34 = vector.extract_strided_slice %31 {offsets = [2, 0], sizes = [48, 32], strides = [1, 1]} : vector<50x32xbf16> to vector<48x32xbf16>
    %35 = tpu.concatenate %32, %33, %34 in 1 : vector<48x32xbf16>, vector<48x32xbf16>, vector<48x32xbf16> -> vector<48x96xbf16>
    %cst_16 = arith.constant 0.000000e+00 : bf16
    %36 = vector.broadcast %cst_16 : bf16 to vector<48x32xbf16>
    %37 = tpu.concatenate %35, %36 in 1 : vector<48x96xbf16>, vector<48x32xbf16> -> vector<48x128xbf16>
    %c0_17 = arith.constant 0 : index
    %c0_18 = arith.constant 0 : index
    %38 = vector.load %arg7[%c0_17, %c0_18] : memref<128x32xbf16, #tpu.memory_space<vmem>>, vector<128x32xbf16>
    %cst_19 = arith.constant dense<0.000000e+00> : vector<48x32xf32>
    %39 = tpu.matmul %37, %38, %cst_19 {dimension_numbers = #tpu.dot_dimension_numbers<[1], [0], [0], [1], [0, 0, 1, 1], [], []>} : vector<48x128xbf16>, vector<128x32xbf16>, vector<48x32xf32> -> vector<48x32xf32>
    %c0_20 = arith.constant 0 : index
    %c0_21 = arith.constant 0 : index
    %40 = vector.load %arg8[%c0_20, %c0_21] : memref<1x32xf32, #tpu.memory_space<vmem>>, vector<1x32xf32>
    %41 = vector.broadcast %40 : vector<1x32xf32> to vector<48x32xf32>
    %42 = arith.addf %39, %41 : vector<48x32xf32>
    %cst_22 = arith.constant 0.000000e+00 : f32
    %43 = vector.broadcast %cst_22 : f32 to vector<48x32xf32>
    %44 = arith.maximumf %42, %43 : vector<48x32xf32>
    %45 = vector.extract_strided_slice %44 {offsets = [0, 0], sizes = [16, 32], strides = [1, 1]} : vector<48x32xf32> to vector<16x32xf32>
    %cst_23 = arith.constant dense<0xFF800000> : vector<32xf32>
    %46 = vector.multi_reduction <maximumf>, %45, %cst_23 [0] : vector<16x32xf32> to vector<32xf32>
    %47 = vector.shape_cast %46 : vector<32xf32> to vector<1x32xf32>
    %48 = vector.extract_strided_slice %44 {offsets = [24, 0], sizes = [16, 32], strides = [1, 1]} : vector<48x32xf32> to vector<16x32xf32>
    %cst_24 = arith.constant dense<0xFF800000> : vector<32xf32>
    %49 = vector.multi_reduction <maximumf>, %48, %cst_24 [0] : vector<16x32xf32> to vector<32xf32>
    %50 = vector.shape_cast %49 : vector<32xf32> to vector<1x32xf32>
    %51 = tpu.concatenate %47, %50 in 0 : vector<1x32xf32>, vector<1x32xf32> -> vector<2x32xf32>
    %52 = tpu.iota {dimensions = array<i32: 1>} : vector<32x128xi32>
    %c0_25 = arith.constant 0 : index
    %c0_26 = arith.constant 0 : index
    %53 = vector.load %arg1[%c0_25, %c0_26] : memref<32x1xi32, #tpu.memory_space<vmem>>, vector<32x1xi32>
    %54 = vector.broadcast %53 : vector<32x1xi32> to vector<32x128xi32>
    %55 = arith.cmpi eq, %54, %52 : vector<32x128xi32>
    %cst_27 = arith.constant 1.000000e+00 : f32
    %cst_28 = arith.constant 0.000000e+00 : f32
    %56 = vector.broadcast %cst_27 : f32 to vector<32x128xf32>
    %57 = vector.broadcast %cst_28 : f32 to vector<32x128xf32>
    %58 = arith.select %55, %56, %57 : vector<32x128xi1>, vector<32x128xf32>
    %59 = arith.truncf %58 : vector<32x128xf32> to vector<32x128xbf16>
    %c0_29 = arith.constant 0 : index
    %c0_30 = arith.constant 0 : index
    %60 = vector.load %arg4[%c0_29, %c0_30] : memref<128x32xbf16, #tpu.memory_space<vmem>>, vector<128x32xbf16>
    %cst_31 = arith.constant dense<0.000000e+00> : vector<32x32xf32>
    %61 = tpu.matmul %59, %60, %cst_31 {dimension_numbers = #tpu.dot_dimension_numbers<[1], [0], [0], [1], [0, 0, 1, 1], [], []>} : vector<32x128xbf16>, vector<128x32xbf16>, vector<32x32xf32> -> vector<32x32xf32>
    %62 = arith.truncf %61 : vector<32x32xf32> to vector<32x32xbf16>
    %cst_32 = arith.constant 0.000000e+00 : bf16
    %63 = vector.broadcast %cst_32 : bf16 to vector<1x32xbf16>
    %64 = tpu.concatenate %63, %62, %63 in 0 : vector<1x32xbf16>, vector<32x32xbf16>, vector<1x32xbf16> -> vector<34x32xbf16>
    %65 = vector.extract_strided_slice %64 {offsets = [0, 0], sizes = [32, 32], strides = [1, 1]} : vector<34x32xbf16> to vector<32x32xbf16>
    %66 = vector.extract_strided_slice %64 {offsets = [1, 0], sizes = [32, 32], strides = [1, 1]} : vector<34x32xbf16> to vector<32x32xbf16>
    %67 = vector.extract_strided_slice %64 {offsets = [2, 0], sizes = [32, 32], strides = [1, 1]} : vector<34x32xbf16> to vector<32x32xbf16>
    %68 = tpu.concatenate %65, %66, %67 in 1 : vector<32x32xbf16>, vector<32x32xbf16>, vector<32x32xbf16> -> vector<32x96xbf16>
    %cst_33 = arith.constant 0.000000e+00 : bf16
    %69 = vector.broadcast %cst_33 : bf16 to vector<32x32xbf16>
    %70 = tpu.concatenate %68, %69 in 1 : vector<32x96xbf16>, vector<32x32xbf16> -> vector<32x128xbf16>
    %c0_34 = arith.constant 0 : index
    %c0_35 = arith.constant 0 : index
    %71 = vector.load %arg9[%c0_34, %c0_35] : memref<128x32xbf16, #tpu.memory_space<vmem>>, vector<128x32xbf16>
    %cst_36 = arith.constant dense<0.000000e+00> : vector<32x32xf32>
    %72 = tpu.matmul %70, %71, %cst_36 {dimension_numbers = #tpu.dot_dimension_numbers<[1], [0], [0], [1], [0, 0, 1, 1], [], []>} : vector<32x128xbf16>, vector<128x32xbf16>, vector<32x32xf32> -> vector<32x32xf32>
    %c0_37 = arith.constant 0 : index
    %c0_38 = arith.constant 0 : index
    %73 = vector.load %arg10[%c0_37, %c0_38] : memref<1x32xf32, #tpu.memory_space<vmem>>, vector<1x32xf32>
    %74 = vector.broadcast %73 : vector<1x32xf32> to vector<32x32xf32>
    %75 = arith.addf %72, %74 : vector<32x32xf32>
    %cst_39 = arith.constant 0.000000e+00 : f32
    %76 = vector.broadcast %cst_39 : f32 to vector<32x32xf32>
    %77 = arith.maximumf %75, %76 : vector<32x32xf32>
    %c0_40 = arith.constant 0 : index
    %c0_41 = arith.constant 0 : index
    %78 = vector.load %arg3[%c0_40, %c0_41] : memref<32x1xf32, #tpu.memory_space<vmem>>, vector<32x1xf32>
    %79 = vector.broadcast %78 : vector<32x1xf32> to vector<32x32xf32>
    %80 = arith.mulf %77, %79 : vector<32x32xf32>
    %81 = arith.truncf %80 : vector<32x32xf32> to vector<32x32xbf16>
    %cst_42 = arith.constant 0.000000e+00 : bf16
    %82 = vector.broadcast %cst_42 : bf16 to vector<1x32xbf16>
    %83 = tpu.concatenate %82, %81, %82 in 0 : vector<1x32xbf16>, vector<32x32xbf16>, vector<1x32xbf16> -> vector<34x32xbf16>
    %84 = vector.extract_strided_slice %83 {offsets = [0, 0], sizes = [32, 32], strides = [1, 1]} : vector<34x32xbf16> to vector<32x32xbf16>
    %85 = vector.extract_strided_slice %83 {offsets = [1, 0], sizes = [32, 32], strides = [1, 1]} : vector<34x32xbf16> to vector<32x32xbf16>
    %86 = vector.extract_strided_slice %83 {offsets = [2, 0], sizes = [32, 32], strides = [1, 1]} : vector<34x32xbf16> to vector<32x32xbf16>
    %87 = tpu.concatenate %84, %85, %86 in 1 : vector<32x32xbf16>, vector<32x32xbf16>, vector<32x32xbf16> -> vector<32x96xbf16>
    %cst_43 = arith.constant 0.000000e+00 : bf16
    %88 = vector.broadcast %cst_43 : bf16 to vector<32x32xbf16>
    %89 = tpu.concatenate %87, %88 in 1 : vector<32x96xbf16>, vector<32x32xbf16> -> vector<32x128xbf16>
    %c0_44 = arith.constant 0 : index
    %c0_45 = arith.constant 0 : index
    %90 = vector.load %arg11[%c0_44, %c0_45] : memref<128x32xbf16, #tpu.memory_space<vmem>>, vector<128x32xbf16>
    %cst_46 = arith.constant dense<0.000000e+00> : vector<32x32xf32>
    %91 = tpu.matmul %89, %90, %cst_46 {dimension_numbers = #tpu.dot_dimension_numbers<[1], [0], [0], [1], [0, 0, 1, 1], [], []>} : vector<32x128xbf16>, vector<128x32xbf16>, vector<32x32xf32> -> vector<32x32xf32>
    %c0_47 = arith.constant 0 : index
    %c0_48 = arith.constant 0 : index
    %92 = vector.load %arg12[%c0_47, %c0_48] : memref<1x32xf32, #tpu.memory_space<vmem>>, vector<1x32xf32>
    %93 = vector.broadcast %92 : vector<1x32xf32> to vector<32x32xf32>
    %94 = arith.addf %91, %93 : vector<32x32xf32>
    %cst_49 = arith.constant 0.000000e+00 : f32
    %95 = vector.broadcast %cst_49 : f32 to vector<32x32xf32>
    %96 = arith.maximumf %94, %95 : vector<32x32xf32>
    %97 = vector.extract_strided_slice %96 {offsets = [0, 0], sizes = [12, 32], strides = [1, 1]} : vector<32x32xf32> to vector<12x32xf32>
    %cst_50 = arith.constant dense<0xFF800000> : vector<32xf32>
    %98 = vector.multi_reduction <maximumf>, %97, %cst_50 [0] : vector<12x32xf32> to vector<32xf32>
    %99 = vector.shape_cast %98 : vector<32xf32> to vector<1x32xf32>
    %100 = vector.extract_strided_slice %96 {offsets = [16, 0], sizes = [12, 32], strides = [1, 1]} : vector<32x32xf32> to vector<12x32xf32>
    %cst_51 = arith.constant dense<0xFF800000> : vector<32xf32>
    %101 = vector.multi_reduction <maximumf>, %100, %cst_51 [0] : vector<12x32xf32> to vector<32xf32>
    %102 = vector.shape_cast %101 : vector<32xf32> to vector<1x32xf32>
    %103 = tpu.concatenate %99, %102 in 0 : vector<1x32xf32>, vector<1x32xf32> -> vector<2x32xf32>
    %104 = tpu.concatenate %51, %103 in 1 : vector<2x32xf32>, vector<2x32xf32> -> vector<2x64xf32>
    %105 = arith.truncf %104 : vector<2x64xf32> to vector<2x64xbf16>
    %c0_52 = arith.constant 0 : index
    %c0_53 = arith.constant 0 : index
    %106 = vector.load %arg13[%c0_52, %c0_53] : memref<64x32xbf16, #tpu.memory_space<vmem>>, vector<64x32xbf16>
    %cst_54 = arith.constant dense<0.000000e+00> : vector<2x32xf32>
    %107 = tpu.matmul %105, %106, %cst_54 {dimension_numbers = #tpu.dot_dimension_numbers<[1], [0], [0], [1], [0, 0, 1, 1], [], []>} : vector<2x64xbf16>, vector<64x32xbf16>, vector<2x32xf32> -> vector<2x32xf32>
    %c0_55 = arith.constant 0 : index
    %c0_56 = arith.constant 0 : index
    %108 = vector.load %arg14[%c0_55, %c0_56] : memref<1x32xf32, #tpu.memory_space<vmem>>, vector<1x32xf32>
    %109 = vector.broadcast %108 : vector<1x32xf32> to vector<2x32xf32>
    %110 = arith.addf %107, %109 : vector<2x32xf32>
    %cst_57 = arith.constant 0.000000e+00 : f32
    %111 = vector.broadcast %cst_57 : f32 to vector<2x32xf32>
    %112 = arith.maximumf %110, %111 : vector<2x32xf32>
    %113 = arith.truncf %112 : vector<2x32xf32> to vector<2x32xbf16>
    %c0_58 = arith.constant 0 : index
    %c0_59 = arith.constant 0 : index
    %114 = vector.load %arg15[%c0_58, %c0_59] : memref<32x128xbf16, #tpu.memory_space<vmem>>, vector<32x128xbf16>
    %cst_60 = arith.constant dense<0.000000e+00> : vector<2x128xf32>
    %115 = tpu.matmul %113, %114, %cst_60 {dimension_numbers = #tpu.dot_dimension_numbers<[1], [0], [0], [1], [0, 0, 1, 1], [], []>} : vector<2x32xbf16>, vector<32x128xbf16>, vector<2x128xf32> -> vector<2x128xf32>
    %c0_61 = arith.constant 0 : index
    %c0_62 = arith.constant 0 : index
    %116 = vector.load %arg16[%c0_61, %c0_62] : memref<1x128xf32, #tpu.memory_space<vmem>>, vector<1x128xf32>
    %117 = vector.broadcast %116 : vector<1x128xf32> to vector<2x128xf32>
    %118 = arith.addf %115, %117 : vector<2x128xf32>
    %c0_63 = arith.constant 0 : index
    %c0_64 = arith.constant 0 : index
    %119 = vector.load %arg17[%c0_63, %c0_64] : memref<2x128xf32, #tpu.memory_space<vmem>>, vector<2x128xf32>
    tpu.vector_store %arg17[%c0_63, %c0_64], %118 {strides = array<i32>} : memref<2x128xf32, #tpu.memory_space<vmem>>, vector<2x128xf32>,
    return
  }
}

</mosaic_0001>

<bundles_post_ra>
// kernel: tile.13
= control target key start
LH: loop header
LB: loop body
LE: loop exit
PB: predicated region body
PF: predicated region fallthrough
CT: control target
= control target key end

     0   :  { %s22_s0 = inlined_call_operand.vmem [shape: f32[24], index: 0, kind: input, shape index: {}]   ;;  %s23_s1 = inlined_call_operand.vmem [shape: f32[2,24], index: 1, kind: output, shape index: {}]  }
   0x1   :  { %v4_v0 = vld [vmem:[%s22_s0] ss:$0 sm:$0xff] }
   0x2   :  { %5 = vst [vmem:[%s23_s1] sm:$0x3] %v4_v0 }

// kernel: tile.18
= control target key start
LH: loop header
LB: loop body
LE: loop exit
PB: predicated region body
PF: predicated region fallthrough
CT: control target
= control target key end

     0   :  { %s22_s0 = inlined_call_operand.vmem [shape: f32[16], index: 0, kind: input, shape index: {}]   ;;  %s23_s1 = inlined_call_operand.vmem [shape: f32[2,16], index: 1, kind: output, shape index: {}]  }
   0x1   :  { %v4_v0 = vld [vmem:[%s22_s0] ss:$0 sm:$0xff] }
   0x2   :  { %5 = vst [vmem:[%s23_s1] sm:$0x3] %v4_v0 }

// kernel: tile.1
= control target key start
LH: loop header
LB: loop body
LE: loop exit
PB: predicated region body
PF: predicated region fallthrough
CT: control target
= control target key end

     0   :  { %s130_s8 = smov 125   ;;  %s131_s9 = smov 126   ;;  %vm7_vm0 = vcmask 7168   ;;  %s221_s0 = inlined_call_operand.vmem [shape: f32[2,16], index: 0, kind: input, shape index: {}]   ;;  %s222_s1 = inlined_call_operand.vmem [shape: f32[32,1], index: 1, kind: output, shape index: {}]  }
   0x1   :  { %v4_v0 = vld [vmem:[%s221_s0] sm:$0x3]  ;;  %s129_s0 = smov 127   ;;  %s132_s10 = smov 124  }
   0x2   :  { %5 = vst [vmem:[#allocation0] sm:$0x3] %v4_v0  ;;  %s133_s11 = smov 123   ;;  %s134_s12 = smov 122  }
   0x3   :  { %s135_s13 = smov 121   ;;  %s136_s14 = smov 120  }
   0x4   :  { %s137_s17 = smov 119   ;;  %s138_s18 = smov 118  }
   0x5   :  { %s139_s19 = smov 117   ;;  %s140_s20 = smov 116  }
   0x6   :  { %s141_s21 = smov 115   ;;  %s142_s22 = smov 114  }
   0x7   :  { %s143_s23 = smov 113  }
   0x9   :  { %v9_v1 = vld [vmem:[#allocation0] sm:$0x3]  }
   0xa   :  { %v21_v2 = vld [vmem:[#allocation0] sm:$0x3]   ;;  %10 = vrot.lane.b32.xlu0 %v9_v1, %s129_s0 }
   0xb   :  { %22 = vrot.lane.b32.xlu1 %v21_v2, %s130_s8  ;;  %v15_v3 = vld [vmem:[#allocation0] sm:$0x3]  }
   0xc   :  { %v27_v4 = vld [vmem:[#allocation0] sm:$0x3]  }
   0xd   :  { %v33_v5 = vld [vmem:[#allocation0] sm:$0x3]  }
   0xe   :  { %16 = vrot.lane.b32.xlu0 %v15_v3, %s131_s9  ;;  %v39_v6 = vld [vmem:[#allocation0] sm:$0x3]  }
   0xf   :  { %28 = vrot.lane.b32.xlu1 %v27_v4, %s132_s10  ;;  %v45_v7 = vld [vmem:[#allocation0] sm:$0x3]  }
  0x10   :  { %v51_v8 = vld [vmem:[#allocation0] sm:$0x3]  }
  0x11   :  { %v57_v9 = vld [vmem:[#allocation0] sm:$0x3]  }
  0x12   :  { %34 = vrot.lane.b32.xlu0 %v33_v5, %s133_s11  ;;  %v63_v10 = vld [vmem:[#allocation0] sm:$0x3]  }
  0x13   :  { %40 = vrot.lane.b32.xlu1 %v39_v6, %s134_s12  ;;  %v6_v11 = vld [vmem:[#allocation0] sm:$0x3]  }
  0x14   :  { %8 = vst.msk [vmem:[%s222_s1] ss:$16 sm:$0x3] %vm7_vm0, %v6_v11   ;;  %v69_v12 = vld [vmem:[#allocation0] sm:$0x3]  }
  0x15   :  { %v75_v13 = vld [vmem:[#allocation0] sm:$0x3]  }
  0x16   :  { %46 = vrot.lane.b32.xlu0 %v45_v7, %s135_s13  ;;  %v81_v14 = vld [vmem:[#allocation0] sm:$0x3]  }
  0x17   :  { %52 = vrot.lane.b32.xlu1 %v51_v8, %s136_s14  ;;  %v87_v15 = vld [vmem:[#allocation0] sm:$0x3]  }
  0x18   :  { %v93_v16 = vld [vmem:[#allocation0] sm:$0x3]  }
  0x1a   :  { %58 = vrot.lane.b32.xlu0 %v57_v9, %s137_s17 }
  0x1b   :  { %64 = vrot.lane.b32.xlu1 %v63_v10, %s138_s18 }
  0x1e   :  { %70 = vrot.lane.b32.xlu0 %v69_v12, %s139_s19 }
  0x1f   :  { %76 = vrot.lane.b32.xlu1 %v75_v13, %s140_s20 }
  0x22   :  { %82 = vrot.lane.b32.xlu0 %v81_v14, %s141_s21 }
  0x23   :  { %88 = vrot.lane.b32.xlu1 %v87_v15, %s142_s22 }
  0x26   :  { %94 = vrot.lane.b32.xlu0 %v93_v16, %s143_s23 }
  0x7c   :  { %v11_v17 = vpop.permute.xlu0 %10  }
  0x7d   :  { %v23_v18 = vpop.permute.xlu1 %22   ;;  %99 = vst.msk [vmem:[%s222_s1 + $0x1] ss:$16 sm:$0x3] %vm7_vm0, %v11_v17  }
  0x7e   :  { %101 = vst.msk [vmem:[%s222_s1 + $0x3] ss:$16 sm:$0x3] %vm7_vm0, %v23_v18  }
  0x80   :  { %v17_v19 = vpop.permute.xlu0 %16  }
  0x81   :  { %v29_v20 = vpop.permute.xlu1 %28   ;;  %100 = vst.msk [vmem:[%s222_s1 + $0x2] ss:$16 sm:$0x3] %vm7_vm0, %v17_v19  }
  0x82   :  { %102 = vst.msk [vmem:[%s222_s1 + $0x4] ss:$16 sm:$0x3] %vm7_vm0, %v29_v20  }
  0x84   :  { %v35_v21 = vpop.permute.xlu0 %34  }
  0x85   :  { %v41_v22 = vpop.permute.xlu1 %40   ;;  %103 = vst.msk [vmem:[%s222_s1 + $0x5] ss:$16 sm:$0x3] %vm7_vm0, %v35_v21  }
  0x86   :  { %104 = vst.msk [vmem:[%s222_s1 + $0x6] ss:$16 sm:$0x3] %vm7_vm0, %v41_v22  }
  0x88   :  { %v47_v23 = vpop.permute.xlu0 %46  }
  0x89   :  { %v53_v24 = vpop.permute.xlu1 %52   ;;  %105 = vst.msk [vmem:[%s222_s1 + $0x7] ss:$16 sm:$0x3] %vm7_vm0, %v47_v23  }
  0x8a   :  { %106 = vst.msk [vmem:[%s222_s1 + $0x8] ss:$16 sm:$0x3] %vm7_vm0, %v53_v24  }
  0x8c   :  { %v59_v25 = vpop.permute.xlu0 %58  }
  0x8d   :  { %v65_v26 = vpop.permute.xlu1 %64   ;;  %107 = vst.msk [vmem:[%s222_s1 + $0x9] ss:$16 sm:$0x3] %vm7_vm0, %v59_v25  }
  0x8e   :  { %108 = vst.msk [vmem:[%s222_s1 + $0xa] ss:$16 sm:$0x3] %vm7_vm0, %v65_v26  }
  0x90   :  { %v71_v27 = vpop.permute.xlu0 %70  }
  0x91   :  { %v77_v28 = vpop.permute.xlu1 %76   ;;  %109 = vst.msk [vmem:[%s222_s1 + $0xb] ss:$16 sm:$0x3] %vm7_vm0, %v71_v27  }
  0x92   :  { %110 = vst.msk [vmem:[%s222_s1 + $0xc] ss:$16 sm:$0x3] %vm7_vm0, %v77_v28  }
  0x94   :  { %v83_v29 = vpop.permute.xlu0 %82  }
  0x95   :  { %v89_v30 = vpop.permute.xlu1 %88   ;;  %111 = vst.msk [vmem:[%s222_s1 + $0xd] ss:$16 sm:$0x3] %vm7_vm0, %v83_v29  }
  0x96   :  { %112 = vst.msk [vmem:[%s222_s1 + $0xe] ss:$16 sm:$0x3] %vm7_vm0, %v89_v30  }
  0x98   :  { %v95_v31 = vpop.permute.xlu0 %94  }
  0x99   :  { %113 = vst.msk [vmem:[%s222_s1 + $0xf] ss:$16 sm:$0x3] %vm7_vm0, %v95_v31  }

// kernel: tile.0
= control target key start
LH: loop header
LB: loop body
LE: loop exit
PB: predicated region body
PF: predicated region fallthrough
CT: control target
= control target key end

     0   :  { %s226_s8 = smov 125   ;;  %s227_s9 = smov 126   ;;  %vm7_vm0 = vcmask 7168   ;;  %s357_s0 = inlined_call_operand.vmem [shape: f32[2,24], index: 0, kind: input, shape index: {}]   ;;  %s358_s1 = inlined_call_operand.vmem [shape: f32[48,1], index: 1, kind: output, shape index: {}]  }
   0x1   :  { %v4_v0 = vld [vmem:[%s357_s0] sm:$0x3]  ;;  %s225_s0 = smov 127   ;;  %s228_s10 = smov 124  }
   0x2   :  { %5 = vst [vmem:[#allocation0] sm:$0x3] %v4_v0  ;;  %s52_s11 = smov 3  ;;  %s229_s12 = smov 123  }
   0x3   :  { %s230_s13 = smov 122   ;;  %s60_s14 = smov 3 }
   0x4   :  { %s68_s15 = smov 3  ;;  %s231_s16 = smov 121  }
   0x5   :  { %s232_s17 = smov 120   ;;  %s76_s18 = smov 3 }
   0x6   :  { %s84_s19 = smov 3  ;;  %s233_s20 = smov 119  }
   0x7   :  { %s234_s21 = smov 118   ;;  %s92_s22 = smov 3 }
   0x8   :  { %s100_s23 = smov 3  ;;  %s235_s24 = smov 117  }
   0x9   :  { %v9_v1 = vld [vmem:[#allocation0] sm:$0x3]   ;;  %s236_s25 = smov 116   ;;  %s108_s26 = smov 3 }
   0xa   :  { %v21_v2 = vld [vmem:[#allocation0] sm:$0x3]   ;;  %10 = vrot.lane.b32.xlu0 %v9_v1, %s225_s0  ;;  %s116_s27 = smov 3  ;;  %s237_s28 = smov 115  }
   0xb   :  { %22 = vrot.lane.b32.xlu1 %v21_v2, %s226_s8  ;;  %v15_v3 = vld [vmem:[#allocation0] sm:$0x3]   ;;  %s238_s29 = smov 114   ;;  %s124_s30 = smov 3 }
   0xc   :  { %v27_v4 = vld [vmem:[#allocation0] sm:$0x3]   ;;  %s132_s2 = smov 3  ;;  %s239_s3 = smov 113  }
   0xd   :  { %v33_v5 = vld [vmem:[#allocation0] sm:$0x3]   ;;  %s240_s4 = smov 112   ;;  %s140_s5 = smov 3 }
   0xe   :  { %16 = vrot.lane.b32.xlu0 %v15_v3, %s227_s9  ;;  %v39_v6 = vld [vmem:[#allocation0] sm:$0x3]   ;;  %s148_s6 = smov 3  ;;  %s241_s8 = smov 111  }
   0xf   :  { %28 = vrot.lane.b32.xlu1 %v27_v4, %s228_s10  ;;  %v45_v7 = vld [vmem:[#allocation0] sm:$0x3]   ;;  %s242_s9 = smov 110   ;;  %s156_s10 = smov 3 }
  0x10   :  { %v53_v8 = vld [vmem:[#allocation0 + $0x1] ss:$-1 sm:%s52_s11]   ;;  %s164_s11 = smov 3 }
  0x11   :  { %v61_v9 = vld [vmem:[#allocation0 + $0x1] ss:$-1 sm:%s60_s14]   ;;  %s172_s14 = smov 3 }
  0x12   :  { %34 = vrot.lane.b32.xlu0 %v33_v5, %s229_s12  ;;  %v69_v10 = vld [vmem:[#allocation0 + $0x1] ss:$-1 sm:%s68_s15]   ;;  %s243_s12 = smov 109   ;;  %s245_s15 = smov 107  }
  0x13   :  { %40 = vrot.lane.b32.xlu1 %v39_v6, %s230_s13  ;;  %v77_v11 = vld [vmem:[#allocation0 + $0x1] ss:$-1 sm:%s76_s18]   ;;  %s244_s13 = smov 108  }
  0x14   :  { %v85_v12 = vld [vmem:[#allocation0 + $0x1] ss:$-1 sm:%s84_s19]  }
  0x15   :  { %v93_v13 = vld [vmem:[#allocation0 + $0x1] ss:$-1 sm:%s92_s22]  }
  0x16   :  { %46 = vrot.lane.b32.xlu0 %v45_v7, %s231_s16  ;;  %v101_v14 = vld [vmem:[#allocation0 + $0x1] ss:$-1 sm:%s100_s23]   ;;  %s246_s16 = smov 106  }
  0x17   :  { %54 = vrot.lane.b32.xlu1 %v53_v8, %s232_s17  ;;  %v109_v15 = vld [vmem:[#allocation0 + $0x1] ss:$-1 sm:%s108_s26]   ;;  %s247_s17 = smov 105  }
  0x18   :  { %v117_v16 = vld [vmem:[#allocation0 + $0x1] ss:$-1 sm:%s116_s27]  }
  0x19   :  { %v125_v17 = vld [vmem:[#allocation0 + $0x1] ss:$-1 sm:%s124_s30]  }
  0x1a   :  { %62 = vrot.lane.b32.xlu0 %v61_v9, %s233_s20  ;;  %v133_v18 = vld [vmem:[#allocation0 + $0x1] ss:$-1 sm:%s132_s2]  }
  0x1b   :  { %70 = vrot.lane.b32.xlu1 %v69_v10, %s234_s21  ;;  %v6_v19 = vld [vmem:[#allocation0] sm:$0x3]  }
  0x1c   :  { %8 = vst.msk [vmem:[%s358_s1] ss:$24 sm:$0x3] %vm7_vm0, %v6_v19   ;;  %v141_v20 = vld [vmem:[#allocation0 + $0x1] ss:$-1 sm:%s140_s5]  }
  0x1d   :  { %v149_v21 = vld [vmem:[#allocation0 + $0x1] ss:$-1 sm:%s148_s6]  }
  0x1e   :  { %78 = vrot.lane.b32.xlu0 %v77_v11, %s235_s24  ;;  %v157_v22 = vld [vmem:[#allocation0 + $0x1] ss:$-1 sm:%s156_s10]  }
  0x1f   :  { %86 = vrot.lane.b32.xlu1 %v85_v12, %s236_s25  ;;  %v165_v23 = vld [vmem:[#allocation0 + $0x1] ss:$-1 sm:%s164_s11]  }
  0x20   :  { %v173_v24 = vld [vmem:[#allocation0 + $0x1] ss:$-1 sm:%s172_s14]  }
  0x22   :  { %94 = vrot.lane.b32.xlu0 %v93_v13, %s237_s28 }
  0x23   :  { %102 = vrot.lane.b32.xlu1 %v101_v14, %s238_s29 }
  0x26   :  { %110 = vrot.lane.b32.xlu0 %v109_v15, %s239_s3 }
  0x27   :  { %118 = vrot.lane.b32.xlu1 %v117_v16, %s240_s4 }
  0x2a   :  { %126 = vrot.lane.b32.xlu0 %v125_v17, %s241_s8 }
  0x2b   :  { %134 = vrot.lane.b32.xlu1 %v133_v18, %s242_s9 }
  0x2e   :  { %142 = vrot.lane.b32.xlu0 %v141_v20, %s243_s12 }
  0x2f   :  { %150 = vrot.lane.b32.xlu1 %v149_v21, %s244_s13 }
  0x32   :  { %158 = vrot.lane.b32.xlu0 %v157_v22, %s245_s15 }
  0x33   :  { %166 = vrot.lane.b32.xlu1 %v165_v23, %s246_s16 }
  0x36   :  { %174 = vrot.lane.b32.xlu0 %v173_v24, %s247_s17 }
  0x7c   :  { %v11_v25 = vpop.permute.xlu0 %10  }
  0x7d   :  { %v23_v26 = vpop.permute.xlu1 %22   ;;  %179 = vst.msk [vmem:[%s358_s1 + $0x1] ss:$24 sm:$0x3] %vm7_vm0, %v11_v25  }
  0x7e   :  { %181 = vst.msk [vmem:[%s358_s1 + $0x3] ss:$24 sm:$0x3] %vm7_vm0, %v23_v26  }
  0x80   :  { %v17_v27 = vpop.permute.xlu0 %16  }
  0x81   :  { %v29_v28 = vpop.permute.xlu1 %28   ;;  %180 = vst.msk [vmem:[%s358_s1 + $0x2] ss:$24 sm:$0x3] %vm7_vm0, %v17_v27  }
  0x82   :  { %182 = vst.msk [vmem:[%s358_s1 + $0x4] ss:$24 sm:$0x3] %vm7_vm0, %v29_v28  }
  0x84   :  { %v35_v29 = vpop.permute.xlu0 %34  }
  0x85   :  { %v41_v30 = vpop.permute.xlu1 %40   ;;  %183 = vst.msk [vmem:[%s358_s1 + $0x5] ss:$24 sm:$0x3] %vm7_vm0, %v35_v29  }
  0x86   :  { %184 = vst.msk [vmem:[%s358_s1 + $0x6] ss:$24 sm:$0x3] %vm7_vm0, %v41_v30  }
  0x88   :  { %v47_v31 = vpop.permute.xlu0 %46  }
  0x89   :  { %v55_v32 = vpop.permute.xlu1 %54   ;;  %185 = vst.msk [vmem:[%s358_s1 + $0x7] ss:$24 sm:$0x3] %vm7_vm0, %v47_v31  }
  0x8a   :  { %186 = vst.msk [vmem:[%s358_s1 + $0x20] ss:$-24 sm:$0x3] %vm7_vm0, %v55_v32  }
  0x8c   :  { %v63_v33 = vpop.permute.xlu0 %62  }
  0x8d   :  { %v71_v34 = vpop.permute.xlu1 %70   ;;  %187 = vst.msk [vmem:[%s358_s1 + $0x21] ss:$-24 sm:$0x3] %vm7_vm0, %v63_v33  }
  0x8e   :  { %188 = vst.msk [vmem:[%s358_s1 + $0x22] ss:$-24 sm:$0x3] %vm7_vm0, %v71_v34  }
  0x90   :  { %v79_v35 = vpop.permute.xlu0 %78  }
  0x91   :  { %v87_v36 = vpop.permute.xlu1 %86   ;;  %189 = vst.msk [vmem:[%s358_s1 + $0x23] ss:$-24 sm:$0x3] %vm7_vm0, %v79_v35  }
  0x92   :  { %190 = vst.msk [vmem:[%s358_s1 + $0x24] ss:$-24 sm:$0x3] %vm7_vm0, %v87_v36  }
  0x94   :  { %v95_v37 = vpop.permute.xlu0 %94  }
  0x95   :  { %v103_v38 = vpop.permute.xlu1 %102   ;;  %191 = vst.msk [vmem:[%s358_s1 + $0x25] ss:$-24 sm:$0x3] %vm7_vm0, %v95_v37  }
  0x96   :  { %192 = vst.msk [vmem:[%s358_s1 + $0x26] ss:$-24 sm:$0x3] %vm7_vm0, %v103_v38  }
  0x98   :  { %v111_v39 = vpop.permute.xlu0 %110  }
  0x99   :  { %v119_v40 = vpop.permute.xlu1 %118   ;;  %193 = vst.msk [vmem:[%s358_s1 + $0x27] ss:$-24 sm:$0x3] %vm7_vm0, %v111_v39  }
  0x9a   :  { %194 = vst.msk [vmem:[%s358_s1 + $0x28] ss:$-24 sm:$0x3] %vm7_vm0, %v119_v40  }
  0x9c   :  { %v127_v41 = vpop.permute.xlu0 %126  }
  0x9d   :  { %v135_v42 = vpop.permute.xlu1 %134   ;;  %195 = vst.msk [vmem:[%s358_s1 + $0x29] ss:$-24 sm:$0x3] %vm7_vm0, %v127_v41  }
  0x9e   :  { %196 = vst.msk [vmem:[%s358_s1 + $0x2a] ss:$-24 sm:$0x3] %vm7_vm0, %v135_v42  }
  0xa0   :  { %v143_v43 = vpop.permute.xlu0 %142  }
  0xa1   :  { %v151_v44 = vpop.permute.xlu1 %150   ;;  %197 = vst.msk [vmem:[%s358_s1 + $0x2b] ss:$-24 sm:$0x3] %vm7_vm0, %v143_v43  }
  0xa2   :  { %198 = vst.msk [vmem:[%s358_s1 + $0x2c] ss:$-24 sm:$0x3] %vm7_vm0, %v151_v44  }
  0xa4   :  { %v159_v45 = vpop.permute.xlu0 %158  }
  0xa5   :  { %v167_v46 = vpop.permute.xlu1 %166   ;;  %199 = vst.msk [vmem:[%s358_s1 + $0x2d] ss:$-24 sm:$0x3] %vm7_vm0, %v159_v45  }
  0xa6   :  { %200 = vst.msk [vmem:[%s358_s1 + $0x2e] ss:$-24 sm:$0x3] %vm7_vm0, %v167_v46  }
  0xa8   :  { %v175_v47 = vpop.permute.xlu0 %174  }
  0xa9   :  { %201 = vst.msk [vmem:[%s358_s1 + $0x2f] ss:$-24 sm:$0x3] %vm7_vm0, %v175_v47  }

// kernel: cnn_encoder_forward.1
= control target key start
LH: loop header
LB: loop body
LE: loop exit
PB: predicated region body
PF: predicated region fallthrough
CT: control target
= control target key end

     0   :  { %s2414_s0 = inlined_call_operand.vmem [shape: s32[48,1], index: 0, kind: input, shape index: {}]   ;;  %s2415_s1 = inlined_call_operand.vmem [shape: s32[32,1], index: 1, kind: input, shape index: {}]   ;;  %s2416_s2 = inlined_call_operand.vmem [shape: f32[48,1], index: 2, kind: input, shape index: {}]   ;;  %s2417_s3 = inlined_call_operand.vmem [shape: f32[32,1], index: 3, kind: input, shape index: {}]   ;;  %s2418_s4 = inlined_call_operand.vmem [shape: bf16[128,32], index: 4, kind: input, shape index: {}]   ;;  %s2419_s5 = inlined_call_operand.vmem [shape: bf16[128,32], index: 5, kind: input, shape index: {}]   ;;  %s2420_s6 = inlined_call_operand.vmem [shape: f32[1,32], index: 6, kind: input, shape index: {}]   ;;  %s2421_s7 = inlined_call_operand.vmem [shape: bf16[128,32], index: 7, kind: input, shape index: {}]   ;;  %s2422_s8 = inlined_call_operand.vmem [shape: f32[1,32], index: 8, kind: input, shape index: {}]   ;;  %s2423_s9 = inlined_call_operand.vmem [shape: bf16[128,32], index: 9, kind: input, shape index: {}]   ;;  %s2424_s10 = inlined_call_operand.vmem [shape: f32[1,32], index: 10, kind: input, shape index: {}]   ;;  %s2425_s11 = inlined_call_operand.vmem [shape: bf16[128,32], index: 11, kind: input, shape index: {}]   ;;  %s2426_s12 = inlined_call_operand.vmem [shape: f32[1,32], index: 12, kind: input, shape index: {}]   ;;  %s2427_s13 = inlined_call_operand.vmem [shape: bf16[64,32], index: 13, kind: input, shape index: {}]   ;;  %s2428_s14 = inlined_call_operand.vmem [shape: f32[1,32], index: 14, kind: input, shape index: {}]   ;;  %s2429_s15 = inlined_call_operand.vmem [shape: bf16[32,128], index: 15, kind: input, shape index: {}]   ;;  %s2430_s16 = inlined_call_operand.vmem [shape: f32[1,128], index: 16, kind: input, shape index: {}]   ;;  %s2431_s17 = inlined_call_operand.hbm [shape: f32[2,128], index: 17, kind: output, shape index: {}]  }
   0x1   :  { %2434 = sst [smem:[#allocation5_spill]] %s2414_s0 }
   0x2   :  { %2435 = sst [smem:[#allocation6_spill]] %s2415_s1 }
   0x3   :  { %s2436_s26 = sld [smem:[#allocation5_spill]]  ;;  %v1815_v2 = vmov 0   ;;  %v1924_v4 = vld [vmem:[%s2418_s4] sm:$0xff]   ;;  %v1816_v6 = vmov 0.0   ;;  %v1935_v7 = vld [vmem:[%s2418_s4 + $0x8] sm:$0xff]   ;;  %v1948_v10 = vld [vmem:[%s2418_s4 + $0x10] sm:$0xff]  }
   0x4   :  { %1744 = vset.pattern.permute.xlu1 %v1815_v2  ;;  %1743 = vset.pattern.permute.xlu0 %v1815_v2  ;;  %vm1817_vm0 = vmmov 0   ;;  %v1958_v11 = vld [vmem:[%s2418_s4 + $0x18] sm:$0xff]   ;;  %v1965_v12 = vld [vmem:[%s2418_s4 + $0x20] sm:$0xff]   ;;  %v1972_v13 = vld [vmem:[%s2418_s4 + $0x28] sm:$0xff]  }
   0x5   :  { %1572 = vmatprep.subr.bf16.mxu0 %v1816_v6  ;;  %1600 = vmatprep.subr.bf16.mxu1 %v1816_v6  ;;  %v1979_v14 = vld [vmem:[%s2418_s4 + $0x30] sm:$0xff]   ;;  %v1986_v15 = vld [vmem:[%s2418_s4 + $0x38] sm:$0xff]  }
   0x6   :  { %1573 = vmatpush3.bf16.msra.mxu0 %v1924_v4  ;;  %1588 = vmatprep.mubr.msk.bf16.mxu0 %vm1817_vm0, %v1816_v6 }
   0x7   :  { %1574 = vmatprep.subr.bf16.mxu0 %v1816_v6  ;;  %1616 = vmatprep.mubr.msk.bf16.mxu1 %vm1817_vm0, %v1816_v6 }
   0x9   :  { %v62_v0 = vld [vmem:[%s2436_s26 + $0x10] sm:$0xff]  ;;  %v60_v1 = vld [vmem:[%s2436_s26] sm:$0xff]  ;;  %v63_v3 = vld [vmem:[%s2436_s26 + $0x18] sm:$0xff] }
   0xa   :  { %73 = vperm.xlu1 %1744, %v62_v0   ;;  %67 = vperm.xlu0 %1743, %v60_v1   ;;  %v61_v5 = vld [vmem:[%s2436_s26 + $0x8] sm:$0xff]  ;;  %v64_v9 = vld [vmem:[%s2436_s26 + $0x20] sm:$0xff] }
   0xb   :  { %v65_v8 = vld [vmem:[%s2436_s26 + $0x28] sm:$0xff]  ;;  %1575 = vmatpush3.bf16.msra.mxu0 %v1935_v7 }
   0xc   :  { %1576 = vmatprep.subr.bf16.mxu0 %v1816_v6 }
   0xe   :  { %76 = vperm.xlu1 %1744, %v63_v3   ;;  %70 = vperm.xlu0 %1743, %v61_v5  }
   0xf   :  { %1577 = vmatpush3.bf16.msra.mxu0 %v1948_v10 }
  0x10   :  { %1578 = vmatprep.subr.bf16.mxu0 %v1816_v6 }
  0x12   :  { %82 = vperm.xlu1 %1744, %v65_v8   ;;  %79 = vperm.xlu0 %1743, %v64_v9  }
  0x13   :  { %1579 = vmatpush3.bf16.msra.mxu0 %v1958_v11 }
  0x14   :  { %1580 = vmatprep.subr.bf16.mxu0 %v1816_v6 }
  0x17   :  { %1581 = vmatpush3.bf16.msra.mxu0 %v1965_v12 }
  0x18   :  { %1582 = vmatprep.subr.bf16.mxu0 %v1816_v6 }
  0x1b   :  { %1583 = vmatpush3.bf16.msra.mxu0 %v1972_v13 }
  0x1c   :  { %1584 = vmatprep.subr.bf16.mxu0 %v1816_v6 }
  0x1f   :  { %1585 = vmatpush3.bf16.msra.mxu0 %v1979_v14 }
  0x20   :  { %1586 = vmatprep.subr.bf16.mxu0 %v1816_v6 }
  0x23   :  { %1587 = vmatpush3.bf16.msra.mxu0 %v1986_v15 }
  0x24   :  { %1628 = vmatprep.subr.bf16.mxu0 %v1816_v6 }
  0x25   :  { %22 = vsyncpa [#allocation3], 0  ;;  %v58_v16 = vlaneseq  ;;  %v1818_v21 = vmov 1.0|1.0   ;;  %v1753_v25 = vld [vmem:[%s2419_s5] sm:$0xff]   ;;  %v1754_v26 = vld [vmem:[%s2419_s5 + $0x8] sm:$0xff]  }
  0x26   :  { %1601 = vmatpush3.bf16.msra.mxu1 %v1753_v25  ;;  %v1755_v27 = vld [vmem:[%s2419_s5 + $0x10] sm:$0xff]   ;;  %v1756_v28 = vld [vmem:[%s2419_s5 + $0x18] sm:$0xff]   ;;  %v1757_v29 = vld [vmem:[%s2419_s5 + $0x20] sm:$0xff]   ;;  %vm223_vm10 = vsmask.f32 256  ;;  %vm249_vm11 = vcmask 1040384  }
  0x27   :  { %v1992_v18 = vand.u32 127, %v58_v16  ;;  %1602 = vmatprep.subr.bf16.mxu1 %v1816_v6  ;;  %v1758_v30 = vld [vmem:[%s2419_s5 + $0x28] sm:$0xff]   ;;  %v1759_v31 = vld [vmem:[%s2419_s5 + $0x30] sm:$0xff]   ;;  %vm2039_vm12 = vmand %vm249_vm11, %vm223_vm10  ;;  %vm290_vm13 = vcmask 1046528   ;;  %vm253_vm14 = vsmask.f32 7424 }
  0x28   :  { %v1760_v44 = vld [vmem:[%s2419_s5 + $0x38] sm:$0xff]   ;;  %s1819_s5 = smov 64   ;;  %s1820_s4 = smov 32   ;;  %vm304_vm15 = vcmask 261120  }
  0x29   :  { %s2439_s25 = sld [smem:[#allocation6_spill]]  ;;  %s1821_s28 = smov [#allocation2]  }
  0x2a   :  { %1603 = vmatpush3.bf16.msra.mxu1 %v1754_v26 }
  0x2b   :  { %1604 = vmatprep.subr.bf16.mxu1 %v1816_v6 }
  0x2e   :  { %1605 = vmatpush3.bf16.msra.mxu1 %v1755_v27 }
  0x2f   :  { %1606 = vmatprep.subr.bf16.mxu1 %v1816_v6 }
  0x32   :  { %1607 = vmatpush3.bf16.msra.mxu1 %v1756_v28 }
  0x33   :  { %1608 = vmatprep.subr.bf16.mxu1 %v1816_v6 }
  0x36   :  { %1609 = vmatpush3.bf16.msra.mxu1 %v1757_v29 }
  0x37   :  { %1610 = vmatprep.subr.bf16.mxu1 %v1816_v6 }
  0x3a   :  { %1611 = vmatpush3.bf16.msra.mxu1 %v1758_v30 }
  0x3b   :  { %1612 = vmatprep.subr.bf16.mxu1 %v1816_v6 }
  0x3e   :  { %1613 = vmatpush3.bf16.msra.mxu1 %v1759_v31 }
  0x3f   :  { %1614 = vmatprep.subr.bf16.mxu1 %v1816_v6 }
  0x42   :  { %1615 = vmatpush3.bf16.msra.mxu1 %v1760_v44  ;;  %v462_v44 = vld [vmem:[%s2416_s2 + $0x10] sm:$0xff] }
  0x43   :  { %1656 = vmatprep.subr.bf16.mxu1 %v1924_v4 }
  0x89   :  { %v68_v17 = vpop.permute.xlu0 %67  ;;  %v74_v20 = vpop.permute.xlu1 %73 }
  0x8a   :  { %vm84_vm2 = vcmp.eq.s32.totalorder %v68_v17, %v1992_v18  ;;  %vm86_vm4 = vcmp.eq.s32.totalorder %v74_v20, %v1992_v18 }
  0x8d   :  { %v71_v19 = vpop.permute.xlu0 %70  ;;  %v77_v22 = vpop.permute.xlu1 %76 }
  0x8e   :  { %vm85_vm1 = vcmp.eq.s32.totalorder %v71_v19, %v1992_v18  ;;  %vm87_vm5 = vcmp.eq.s32.totalorder %v77_v22, %v1992_v18 }
  0x8f   :  { %vm1435_vm3 = vmpackc.low %vm85_vm1, %vm84_vm2  ;;  %vm311_vm1 = vcmask 523264   ;;  %vm318_vm2 = vcmask 785408  }
  0x90   :  { %1589 = vmatmul.mubr.msk.bf16.vlgmr.msra.gmra.mrb[0].mxu0 %vm1435_vm3, %v1818_v21  ;;  %vm1437_vm6 = vmpackc.low %vm87_vm5, %vm86_vm4 }
  0x91   :  { %1592 = vmatprep.mubr.msk.bf16.mxu0 %vm1817_vm0, %v1816_v6  ;;  %v83_v23 = vpop.permute.xlu1 %82  ;;  %v80_v24 = vpop.permute.xlu0 %79 }
  0x92   :  { %vm89_vm7 = vcmp.eq.s32.totalorder %v83_v23, %v1992_v18  ;;  %vm88_vm8 = vcmp.eq.s32.totalorder %v80_v24, %v1992_v18 }
  0x93   :  { %vm1439_vm9 = vmpackc.low %vm89_vm7, %vm88_vm8 }
  0x98   :  { %1593 = vmatmul.mubr.msk.bf16.gmra.mrb[4].mxu0 %vm1437_vm6, %v1818_v21 }
  0x99   :  { %1596 = vmatprep.mubr.msk.bf16.mxu0 %vm1817_vm0, %v1816_v6 }
  0xa0   :  { %1597 = vmatmul.mubr.msk.bf16.gmra.mrb[8].mxu0 %vm1439_vm9, %v1818_v21 }
  0xa1   :  { %1644 = vmatprep.mubr.msk.bf16.mxu0 %vm1817_vm0, %v1816_v6 }
 0x163   :  { %v197_v32 = vpop.f32.mrb[0].mxu0 }
 0x164   :  { %v1590_v33 = vpop.f32.mrb[1].mxu0 }
 0x165   :  { %v200_v34 = vpop.f32.mrb[2].mxu0 }
 0x166   :  { %v220_v35 = vpack.c.bf16 %v200_v34, %v197_v32  ;;  %v1591_v36 = vpop.f32.mrb[3].mxu0 }
 0x167   :  { %v750_v36 = vld [vmem:[%s2439_s25 + $0x8] sm:$0xff] }
 0x168   :  { %v225_v37 = vshrl.u32 %v220_v35, 16  ;;  %v228_v39 = vshll.u32 %v220_v35, 16 }
 0x16a   :  { %v227_v38 = vrot.slane %v225_v37, 7  ;;  %v749_v37 = vld [vmem:[%s2439_s25] sm:$0xff] }
 0x16b   :  { %v205_v41 = vpop.f32.mrb[4].mxu0 }
 0x16c   :  { %v230_v42 = vor.u32 %v228_v39, %v227_v38  ;;  %v1594_v43 = vpop.f32.mrb[5].mxu0  ;;  %v751_v39 = vld [vmem:[%s2439_s25 + $0x10] sm:$0xff] }
 0x16d   :  { %v208_v45 = vpop.f32.mrb[6].mxu0  ;;  %v463_v43 = vld [vmem:[%s2416_s2 + $0x18] sm:$0xff] }
 0x16e   :  { %v2048_v46 = vsel %vm2039_vm12, 0, %v230_v42  ;;  %v221_v47 = vpack.c.bf16 %v208_v45, %v205_v41  ;;  %v1595_v48 = vpop.f32.mrb[7].mxu0  ;;  %v461_v41 = vld [vmem:[%s2416_s2 + $0x8] sm:$0xff]  ;;  %v460_v42 = vld [vmem:[%s2416_s2] sm:$0xff] }
 0x16f   :  { %v257_v50 = vshll.u32 %v2048_v46, 16  ;;  %v291_v61 = vrot.slane %v2048_v46, 1  ;;  %v255_v63 = vshrl.u32 %v2048_v46, 16  ;;  %v465_v45 = vld [vmem:[%s2416_s2 + $0x28] sm:$0xff] }
 0x170   :  { %v232_v49 = vshrl.u32 %v221_v47, 16  ;;  %v235_v52 = vshll.u32 %v221_v47, 16  ;;  %v464_v47 = vld [vmem:[%s2416_s2 + $0x20] sm:$0xff] }
 0x171   :  { %v259_v57 = vrot.slane %v257_v50, 1 }
 0x172   :  { %v234_v51 = vrot.slane %v232_v49, 7 }
 0x173   :  { %v213_v53 = vpop.f32.mrb[8].mxu0  ;;  %v260_v3 = vor.u32 %v259_v57, %v255_v63 }
 0x174   :  { %v237_v54 = vor.u32 %v235_v52, %v234_v51  ;;  %v1598_v55 = vpop.f32.mrb[9].mxu0 }
 0x175   :  { %v216_v56 = vpop.f32.mrb[10].mxu0 }
 0x176   :  { %v2053_v58 = vsel %vm223_vm10, %v227_v38, %v237_v54  ;;  %v222_v59 = vpack.c.bf16 %v216_v56, %v213_v53  ;;  %v1599_v60 = vpop.f32.mrb[11].mxu0  ;;  %v752_v38 = vld [vmem:[%s2439_s25 + $0x18] sm:$0xff] }
 0x177   :  { %v292_v62 = vrot.slane %v2053_v58, 1  ;;  %v262_v0 = vshll.u32 %v2053_v58, 16  ;;  %v266_v22 = vshrl.u32 %v2053_v58, 16  ;;  %v1441_v60 = vld [vmem:[%s2420_s6] ss:$0 sm:$0xff] }
 0x178   :  { %v240_v1 = vshrl.u32 %v222_v59, 16  ;;  %v243_v9 = vshll.u32 %v222_v59, 16  ;;  %v1767_v59 = vld [vmem:[%s2421_s7 + $0x30] sm:$0xff]  }
 0x179   :  { %v293_v2 = vsel %vm290_vm13, %v291_v61, %v292_v62  ;;  %v264_v5 = vrot.slane %v262_v0, 1 }
 0x17a   :  { %v242_v8 = vrot.slane %v240_v1, 7  ;;  %298 = vrot.lane.b32.xlu1 %v293_v2, %s1819_s5 }
 0x17b   :  { %v265_v16 = vsel %vm253_vm14, %v260_v3, %v264_v5  ;;  %v268_v25 = vor.u32 %v266_v22, %v264_v5 }
 0x17c   :  { %v245_v17 = vor.u32 %v243_v9, %v242_v8  ;;  %282 = vrot.lane.b32.xlu0 %v265_v16, %s1820_s4  ;;  %v252_v20 = vsel %vm2039_vm12, %v242_v8, 0 }
 0x17d   :  { %v278_v26 = vshll.u32 %v252_v20, 16  ;;  %v296_v30 = vrot.slane %v252_v20, 1 }
 0x17e   :  { %v2064_v19 = vsel %vm223_vm10, %v234_v51, %v245_v17 }
 0x17f   :  { %v294_v23 = vrot.slane %v2064_v19, 1  ;;  %v270_v24 = vshll.u32 %v2064_v19, 16  ;;  %v274_v29 = vshrl.u32 %v2064_v19, 16  ;;  %v280_v34 = vrot.slane %v278_v26, 1 }
 0x181   :  { %v295_v27 = vsel %vm290_vm13, %v292_v62, %v294_v23  ;;  %v272_v28 = vrot.slane %v270_v24, 1  ;;  %v297_v33 = vsel %vm290_vm13, %v294_v23, %v296_v30 }
 0x182   :  { %300 = vrot.lane.b32.xlu1 %v295_v27, %s1819_s5 }
 0x183   :  { %v273_v31 = vsel %vm253_vm14, %v268_v25, %v272_v28  ;;  %v276_v32 = vor.u32 %v274_v29, %v272_v28 }
 0x184   :  { %284 = vrot.lane.b32.xlu0 %v273_v31, %s1820_s4 }
 0x185   :  { %v281_v35 = vsel %vm253_vm14, %v276_v32, %v280_v34 }
 0x186   :  { %302 = vrot.lane.b32.xlu1 %v297_v33, %s1819_s5 }
 0x188   :  { %286 = vrot.lane.b32.xlu0 %v281_v35, %s1820_s4 }
 0x18a   :  { %757 = vperm.xlu1 %1744, %v750_v36  }
 0x18c   :  { %754 = vperm.xlu0 %1743, %v749_v37   ;;  %v1768_v37 = vld [vmem:[%s2421_s7 + $0x38] sm:$0xff]  }
 0x18e   :  { %763 = vperm.xlu1 %1744, %v752_v38  }
 0x190   :  { %760 = vperm.xlu0 %1743, %v751_v39  }
 0x192   :  { %473 = vperm.xlu1 %1744, %v461_v41  }
 0x194   :  { %468 = vperm.xlu0 %1743, %v460_v42  }
 0x196   :  { %483 = vperm.xlu1 %1744, %v463_v43  }
 0x198   :  { %478 = vperm.xlu0 %1743, %v462_v44  }
 0x19a   :  { %493 = vperm.xlu1 %1744, %v465_v45   ;;  %v2188_v45 = vld [vmem:[%s2423_s9] sm:$0xff]  }
 0x19c   :  { %488 = vperm.xlu0 %1743, %v464_v47  }
 0x1ec   :  { %v299_v49 = vpop.permute.xlu1 %298 }
 0x1ee   :  { %v283_v48 = vpop.permute.xlu0 %282 }
 0x1ef   :  { %v306_v50 = vsel %vm304_vm15, %v2048_v46, %v283_v48 }
 0x1f0   :  { %v313_v51 = vsel %vm311_vm1, %v306_v50, %v299_v49 }
 0x1f1   :  { %1617 = vmatmul.mubr.msk.bf16.vlgmr.msra.gmra.mrb[0].mxu1 %vm318_vm2, %v313_v51 }
 0x1f2   :  { %1657 = vmatpush3.bf16.msra.mxu1 %v1924_v4  ;;  %1620 = vmatprep.mubr.msk.bf16.mxu1 %vm1817_vm0, %v1816_v6 }
 0x1f3   :  { %1658 = vmatprep.subr.bf16.mxu1 %v1935_v7 }
 0x1f4   :  { %v301_v53 = vpop.permute.xlu1 %300 }
 0x1f6   :  { %v285_v52 = vpop.permute.xlu0 %284  ;;  %1659 = vmatpush3.bf16.msra.mxu1 %v1935_v7 }
 0x1f7   :  { %v308_v54 = vsel %vm304_vm15, %v2053_v58, %v285_v52  ;;  %1660 = vmatprep.subr.bf16.mxu1 %v1948_v10  ;;  %v1766_v58 = vld [vmem:[%s2421_s7 + $0x28] sm:$0xff]  }
 0x1f8   :  { %v315_v46 = vsel %vm311_vm1, %v308_v54, %v301_v53  ;;  %v303_v7 = vpop.permute.xlu1 %302 }
 0x1f9   :  { %1621 = vmatmul.mubr.msk.bf16.gmra.mrb[4].mxu1 %vm318_vm2, %v315_v46 }
 0x1fa   :  { %v287_v55 = vpop.permute.xlu0 %286  ;;  %1661 = vmatpush3.bf16.msra.mxu1 %v1948_v10  ;;  %1624 = vmatprep.mubr.msk.bf16.mxu1 %vm1817_vm0, %v1816_v6 }
 0x1fb   :  { %1662 = vmatprep.subr.bf16.mxu1 %v1958_v11  ;;  %v310_v4 = vsel %vm304_vm15, %v2064_v19, %v287_v55 }
 0x1fc   :  { %v317_v56 = vsel %vm311_vm1, %v310_v4, %v303_v7 }
 0x1fe   :  { %1663 = vmatpush3.bf16.msra.mxu1 %v1958_v11 }
 0x1ff   :  { %1664 = vmatprep.subr.bf16.mxu1 %v1965_v12 }
 0x201   :  { %1625 = vmatmul.mubr.msk.bf16.gmra.mrb[8].mxu1 %vm318_vm2, %v317_v56 }
 0x202   :  { %1665 = vmatpush3.bf16.msra.mxu1 %v1965_v12 }
 0x203   :  { %1666 = vmatprep.subr.bf16.mxu1 %v1972_v13 }
 0x206   :  { %1667 = vmatpush3.bf16.msra.mxu1 %v1972_v13  ;;  %v1761_v13 = vld [vmem:[%s2421_s7] sm:$0xff]  }
 0x207   :  { %1668 = vmatprep.subr.bf16.mxu1 %v1979_v14  ;;  %1629 = vmatpush3.bf16.msra.mxu0 %v1761_v13 }
 0x208   :  { %1630 = vmatprep.subr.bf16.mxu0 %v1816_v6 }
 0x209   :  { %v758_v10 = vpop.permute.xlu1 %757 }
 0x20a   :  { %1669 = vmatpush3.bf16.msra.mxu1 %v1979_v14  ;;  %vm766_vm3 = vcmp.eq.s32.totalorder %v758_v10, %v1992_v18  ;;  %v1762_v14 = vld [vmem:[%s2421_s7 + $0x8] sm:$0xff]  }
 0x20b   :  { %v755_v57 = vpop.permute.xlu0 %754  ;;  %1670 = vmatprep.subr.bf16.mxu1 %v1986_v15  ;;  %1631 = vmatpush3.bf16.msra.mxu0 %v1762_v14 }
 0x20c   :  { %vm765_vm4 = vcmp.eq.s32.totalorder %v755_v57, %v1992_v18  ;;  %1632 = vmatprep.subr.bf16.mxu0 %v1816_v6 }
 0x20d   :  { %vm1465_vm5 = vmpackc.low %vm766_vm3, %vm765_vm4  ;;  %v764_v11 = vpop.permute.xlu1 %763 }
 0x20e   :  { %1672 = vmatprep.mubr.msk.bf16.mxu1 %vm1465_vm5, %v1818_v21  ;;  %1671 = vmatpush3.bf16.msra.mxu1 %v1986_v15  ;;  %vm768_vm6 = vcmp.eq.s32.totalorder %v764_v11, %v1992_v18  ;;  %v1763_v15 = vld [vmem:[%s2421_s7 + $0x10] sm:$0xff]  }
 0x20f   :  { %v761_v12 = vpop.permute.xlu0 %760  ;;  %1633 = vmatpush3.bf16.msra.mxu0 %v1763_v15 }
 0x210   :  { %vm767_vm7 = vcmp.eq.s32.totalorder %v761_v12, %v1992_v18  ;;  %v1764_v18 = vld [vmem:[%s2421_s7 + $0x18] sm:$0xff]   ;;  %1634 = vmatprep.subr.bf16.mxu0 %v1816_v6 }
 0x211   :  { %vm1467_vm8 = vmpackc.low %vm768_vm6, %vm767_vm7  ;;  %v474_v8 = vpop.permute.xlu1 %473 }
 0x212   :  { %1673 = vmatmul.mubr.msk.bf16.vlgmr.msra.gmra.mrb[12].mxu1 %vm1467_vm8, %v1818_v21  ;;  %v1765_v21 = vld [vmem:[%s2421_s7 + $0x20] sm:$0xff]  }
 0x213   :  { %1635 = vmatpush3.bf16.msra.mxu0 %v1764_v18  ;;  %v469_v9 = vpop.permute.xlu0 %468 }
 0x214   :  { %1636 = vmatprep.subr.bf16.mxu0 %v1816_v6 }
 0x215   :  { %v484_v32 = vpop.permute.xlu1 %483 }
 0x217   :  { %1637 = vmatpush3.bf16.msra.mxu0 %v1765_v21  ;;  %v479_v33 = vpop.permute.xlu0 %478 }
 0x218   :  { %1638 = vmatprep.subr.bf16.mxu0 %v1816_v6 }
 0x219   :  { %v494_v46 = vpop.permute.xlu1 %493 }
 0x21b   :  { %1639 = vmatpush3.bf16.msra.mxu0 %v1766_v58  ;;  %v489_v55 = vpop.permute.xlu0 %488 }
 0x21c   :  { %1640 = vmatprep.subr.bf16.mxu0 %v1816_v6 }
 0x21f   :  { %1641 = vmatpush3.bf16.msra.mxu0 %v1767_v59 }
 0x220   :  { %1642 = vmatprep.subr.bf16.mxu0 %v1816_v6 }
 0x223   :  { %1643 = vmatpush3.bf16.msra.mxu0 %v1768_v37 }
 0x224   :  { %1676 = vmatprep.subr.bf16.mxu0 %v2188_v45 }
 0x2c4   :  { %v431_v61 = vpop.f32.mrb[0].mxu1 }
 0x2c5   :  { %v432_v62 = vadd.f32 %v1441_v60, %v431_v61  ;;  %v1618_v63 = vpop.f32.mrb[1].mxu1 }
 0x2c6   :  { %v434_v0 = vpop.f32.mrb[2].mxu1 }
 0x2c7   :  { %v454_v1 = vmax.f32 %v432_v62, 0.0  ;;  %v435_v2 = vadd.f32 %v1441_v60, %v434_v0  ;;  %v1619_v3 = vpop.f32.mrb[3].mxu1 }
 0x2c9   :  { %v455_v5 = vmax.f32 %v435_v2, 0.0  ;;  %v496_v16 = vmul.f32 %v469_v9, %v454_v1 }
 0x2cb   :  { %v497_v17 = vmul.f32 %v474_v8, %v455_v5 }
 0x2cc   :  { %v439_v19 = vpop.f32.mrb[4].mxu1 }
 0x2cd   :  { %v502_v20 = vpack.c.bf16 %v497_v17, %v496_v16  ;;  %v440_v22 = vadd.f32 %v1441_v60, %v439_v19  ;;  %v1622_v23 = vpop.f32.mrb[5].mxu1 }
 0x2ce   :  { %v442_v24 = vpop.f32.mrb[6].mxu1 }
 0x2cf   :  { %v506_v25 = vshrl.u32 %v502_v20, 16  ;;  %v456_v26 = vmax.f32 %v440_v22, 0.0  ;;  %v443_v27 = vadd.f32 %v1441_v60, %v442_v24  ;;  %v1623_v28 = vpop.f32.mrb[7].mxu1  ;;  %v509_v30 = vshll.u32 %v502_v20, 16 }
 0x2d1   :  { %v508_v29 = vrot.slane %v506_v25, 7  ;;  %v457_v31 = vmax.f32 %v443_v27, 0.0  ;;  %v498_v35 = vmul.f32 %v479_v33, %v456_v26 }
 0x2d3   :  { %v511_v34 = vor.u32 %v509_v30, %v508_v29  ;;  %v499_v36 = vmul.f32 %v484_v32, %v457_v31 }
 0x2d4   :  { %v447_v38 = vpop.f32.mrb[8].mxu1 }
 0x2d5   :  { %v503_v39 = vpack.c.bf16 %v499_v36, %v498_v35  ;;  %v448_v41 = vadd.f32 %v1441_v60, %v447_v38  ;;  %v1626_v42 = vpop.f32.mrb[9].mxu1  ;;  %v2183_v43 = vsel %vm2039_vm12, 0, %v511_v34 }
 0x2d6   :  { %v450_v44 = vpop.f32.mrb[10].mxu1  ;;  %v535_v51 = vshll.u32 %v2183_v43, 16  ;;  %v568_v12 = vrot.slane %v2183_v43, 1  ;;  %v533_v14 = vshrl.u32 %v2183_v43, 16 }
 0x2d7   :  { %v513_v47 = vshrl.u32 %v503_v39, 16  ;;  %v458_v48 = vmax.f32 %v448_v41, 0.0  ;;  %v451_v49 = vadd.f32 %v1441_v60, %v450_v44  ;;  %v1627_v50 = vpop.f32.mrb[11].mxu1  ;;  %v516_v53 = vshll.u32 %v503_v39, 16 }
 0x2d8   :  { %v537_v10 = vrot.slane %v535_v51, 1 }
 0x2d9   :  { %v515_v52 = vrot.slane %v513_v47, 7  ;;  %v459_v54 = vmax.f32 %v451_v49, 0.0  ;;  %v500_v7 = vmul.f32 %v489_v55, %v458_v48 }
 0x2da   :  { %v538_v58 = vor.u32 %v537_v10, %v533_v14 }
 0x2db   :  { %v518_v4 = vor.u32 %v516_v53, %v515_v52  ;;  %v501_v56 = vmul.f32 %v494_v46, %v459_v54 }
 0x2dd   :  { %v504_v57 = vpack.c.bf16 %v501_v56, %v500_v7  ;;  %v2193_v11 = vsel %vm223_vm10, %v508_v29, %v518_v4 }
 0x2de   :  { %v569_v13 = vrot.slane %v2193_v11, 1  ;;  %v540_v15 = vshll.u32 %v2193_v11, 16  ;;  %v544_v3 = vshrl.u32 %v2193_v11, 16 }
 0x2df   :  { %v521_v18 = vshrl.u32 %v504_v57, 16  ;;  %v524_v61 = vshll.u32 %v504_v57, 16 }
 0x2e0   :  { %v570_v21 = vsel %vm290_vm13, %v568_v12, %v569_v13  ;;  %v542_v59 = vrot.slane %v540_v15, 1  ;;  %v1017_v15 = vld [vmem:[%s2417_s3 + $0x8] sm:$0xff] }
 0x2e1   :  { %v523_v60 = vrot.slane %v521_v18, 7  ;;  %575 = vrot.lane.b32.xlu1 %v570_v21, %s1819_s5  ;;  %v1016_v18 = vld [vmem:[%s2417_s3] sm:$0xff]  ;;  %v1019_v21 = vld [vmem:[%s2417_s3 + $0x18] sm:$0xff] }
 0x2e2   :  { %v543_v62 = vsel %vm253_vm14, %v538_v58, %v542_v59  ;;  %v546_v17 = vor.u32 %v544_v3, %v542_v59  ;;  %v1018_v58 = vld [vmem:[%s2417_s3 + $0x10] sm:$0xff] }
 0x2e3   :  { %v526_v63 = vor.u32 %v524_v61, %v523_v60  ;;  %560 = vrot.lane.b32.xlu0 %v543_v62, %s1820_s4  ;;  %v531_v0 = vsel %vm2039_vm12, %v523_v60, 0  ;;  %v1770_v62 = vld [vmem:[%s2423_s9 + $0x8] sm:$0xff]  }
 0x2e4   :  { %v556_v19 = vshll.u32 %v531_v0, 16  ;;  %v573_v29 = vrot.slane %v531_v0, 1  ;;  %v1771_v0 = vld [vmem:[%s2423_s9 + $0x10] sm:$0xff]  }
 0x2e5   :  { %v1674_v1 = vpop.f32.mrb[12].mxu1  ;;  %v2206_v2 = vsel %vm223_vm10, %v515_v52, %v526_v63 }
 0x2e6   :  { %v809_v5 = vpop.f32.mrb[13].mxu1  ;;  %v571_v8 = vrot.slane %v2206_v2, 1  ;;  %v548_v9 = vshll.u32 %v2206_v2, 16  ;;  %v552_v25 = vshrl.u32 %v2206_v2, 16  ;;  %v558_v35 = vrot.slane %v556_v19, 1 }
 0x2e7   :  { %v1675_v16 = vpop.f32.mrb[14].mxu1 }
 0x2e8   :  { %v825_v20 = vpack.c.bf16 %v1675_v16, %v1674_v1  ;;  %v812_v22 = vpop.f32.mrb[15].mxu1  ;;  %v572_v23 = vsel %vm290_vm13, %v569_v13, %v571_v8  ;;  %v550_v24 = vrot.slane %v548_v9, 1  ;;  %v574_v34 = vsel %vm290_vm13, %v571_v8, %v573_v29  ;;  %v1773_v9 = vld [vmem:[%s2423_s9 + $0x20] sm:$0xff]  }
 0x2e9   :  { %v824_v26 = vpack.c.bf16 %v812_v22, %v809_v5  ;;  %577 = vrot.lane.b32.xlu1 %v572_v23, %s1819_s5  ;;  %v1772_v5 = vld [vmem:[%s2423_s9 + $0x18] sm:$0xff]  }
 0x2ea   :  { %v834_v27 = vshrl.u32 %v825_v20, 16  ;;  %v551_v28 = vsel %vm253_vm14, %v546_v17, %v550_v24  ;;  %v554_v30 = vor.u32 %v552_v25, %v550_v24  ;;  %v837_v33 = vshll.u32 %v825_v20, 16  ;;  %v1774_v17 = vld [vmem:[%s2423_s9 + $0x28] sm:$0xff]   ;;  %v1775_v20 = vld [vmem:[%s2423_s9 + $0x30] sm:$0xff]   ;;  %v1776_v23 = vld [vmem:[%s2423_s9 + $0x38] sm:$0xff]  }
 0x2eb   :  { %v827_v31 = vshrl.u32 %v824_v26, 16  ;;  %562 = vrot.lane.b32.xlu0 %v551_v28, %s1820_s4  ;;  %v830_v37 = vshll.u32 %v824_v26, 16 }
 0x2ec   :  { %v836_v32 = vrot.slane %v834_v27, 7  ;;  %v559_v41 = vsel %vm253_vm14, %v554_v30, %v558_v35  ;;  %v1777_v30 = vld [vmem:[%s2425_s11] sm:$0xff]   ;;  %v1782_v35 = vld [vmem:[%s2425_s11 + $0x28] sm:$0xff]  }
 0x2ed   :  { %v829_v36 = vrot.slane %v827_v31, 7  ;;  %579 = vrot.lane.b32.xlu1 %v574_v34, %s1819_s5  ;;  %v1778_v31 = vld [vmem:[%s2425_s11 + $0x8] sm:$0xff]   ;;  %1696 = vmatprep.subr.bf16.mxu1 %v1777_v30  ;;  %v1781_v34 = vld [vmem:[%s2425_s11 + $0x20] sm:$0xff]  }
 0x2ee   :  { %v839_v38 = vor.u32 %v837_v33, %v836_v32  ;;  %v844_v39 = vsel %vm2039_vm12, %v836_v32, 0  ;;  %1697 = vmatpush3.bf16.msra.mxu1 %v1777_v30  ;;  %v1779_v32 = vld [vmem:[%s2425_s11 + $0x10] sm:$0xff]   ;;  %v1780_v33 = vld [vmem:[%s2425_s11 + $0x18] sm:$0xff]  }
 0x2ef   :  { %v832_v42 = vor.u32 %v830_v37, %v829_v36  ;;  %564 = vrot.lane.b32.xlu0 %v559_v41, %s1820_s4  ;;  %v861_v47 = vshll.u32 %v844_v39, 16  ;;  %v874_v12 = vrot.slane %v844_v39, 1  ;;  %1698 = vmatprep.subr.bf16.mxu1 %v1778_v31  ;;  %v1453_v37 = vld [vmem:[%s2422_s8] ss:$0 sm:$0xff] }
 0x2f0   :  { %v2223_v44 = vsel %vm223_vm10, %v829_v36, %v839_v38  ;;  %v1783_v36 = vld [vmem:[%s2425_s11 + $0x30] sm:$0xff]  }
 0x2f1   :  { %v2227_v48 = vsel %vm2039_vm12, 0, %v832_v42  ;;  %v853_v49 = vshll.u32 %v2223_v44, 16  ;;  %v857_v52 = vshrl.u32 %v2223_v44, 16  ;;  %v863_v55 = vrot.slane %v861_v47, 1 }
 0x2f2   :  { %v848_v50 = vshll.u32 %v2227_v48, 16  ;;  %v846_v53 = vshrl.u32 %v2227_v48, 16  ;;  %v872_v56 = vrot.slane %v2223_v44, 1  ;;  %v871_v57 = vrot.slane %v2227_v48, 1  ;;  %1699 = vmatpush3.bf16.msra.mxu1 %v1778_v31 }
 0x2f3   :  { %v855_v51 = vrot.slane %v853_v49, 1  ;;  %1700 = vmatprep.subr.bf16.mxu1 %v1779_v32 }
 0x2f4   :  { %v850_v54 = vrot.slane %v848_v50, 1  ;;  %v875_v13 = vsel %vm290_vm13, %v872_v56, %v874_v12  ;;  %v873_v14 = vsel %vm290_vm13, %v871_v57, %v872_v56 }
 0x2f5   :  { %v859_v46 = vor.u32 %v857_v52, %v855_v51 }
 0x2f6   :  { %v851_v4 = vor.u32 %v850_v54, %v846_v53  ;;  %1701 = vmatpush3.bf16.msra.mxu1 %v1779_v32 }
 0x2f7   :  { %v864_v7 = vsel %vm253_vm14, %v859_v46, %v863_v55  ;;  %1702 = vmatprep.subr.bf16.mxu1 %v1780_v33 }
 0x2f8   :  { %867 = vrot.lane.b32.xlu1 %v864_v7, %s1820_s4  ;;  %v856_v10 = vsel %vm253_vm14, %v851_v4, %v855_v51 }
 0x2f9   :  { %865 = vrot.lane.b32.xlu0 %v856_v10, %s1820_s4 }
 0x2fa   :  { %1703 = vmatpush3.bf16.msra.mxu1 %v1780_v33 }
 0x2fb   :  { %1704 = vmatprep.subr.bf16.mxu1 %v1781_v34 }
 0x2fc   :  { %878 = vrot.lane.b32.xlu1 %v875_v13, %s1819_s5 }
 0x2fd   :  { %876 = vrot.lane.b32.xlu0 %v873_v14, %s1819_s5 }
 0x2fe   :  { %1705 = vmatpush3.bf16.msra.mxu1 %v1781_v34 }
 0x2ff   :  { %1706 = vmatprep.subr.bf16.mxu1 %v1782_v35 }
 0x300   :  { %1027 = vperm.xlu1 %1744, %v1017_v15  }
 0x301   :  { %1022 = vperm.xlu0 %1743, %v1016_v18  }
 0x302   :  { %1707 = vmatpush3.bf16.msra.mxu1 %v1782_v35 }
 0x303   :  { %1708 = vmatprep.subr.bf16.mxu1 %v1783_v36 }
 0x304   :  { %1037 = vperm.xlu1 %1744, %v1019_v21  }
 0x305   :  { %1032 = vperm.xlu0 %1743, %v1018_v58  }
 0x306   :  { %1709 = vmatpush3.bf16.msra.mxu1 %v1783_v36 }
 0x353   :  { %v576_v60 = vpop.permute.xlu1 %575 }
 0x355   :  { %v561_v59 = vpop.permute.xlu0 %560 }
 0x356   :  { %v582_v61 = vsel %vm304_vm15, %v2183_v43, %v561_v59 }
 0x357   :  { %v588_v63 = vsel %vm311_vm1, %v582_v61, %v576_v60 }
 0x358   :  { %1645 = vmatmul.mubr.msk.bf16.vlgmr.msra.gmra.mrb[12].mxu0 %vm318_vm2, %v588_v63 }
 0x359   :  { %1677 = vmatpush3.bf16.msra.mxu0 %v2188_v45  ;;  %1648 = vmatprep.mubr.msk.bf16.mxu0 %vm1817_vm0, %v1816_v6 }
 0x35a   :  { %1678 = vmatprep.subr.bf16.mxu0 %v1770_v62 }
 0x35b   :  { %v578_v1 = vpop.permute.xlu1 %577 }
 0x35d   :  { %1679 = vmatpush3.bf16.msra.mxu0 %v1770_v62  ;;  %v563_v43 = vpop.permute.xlu0 %562 }
 0x35e   :  { %v584_v3 = vsel %vm304_vm15, %v2193_v11, %v563_v43  ;;  %1680 = vmatprep.subr.bf16.mxu0 %v1771_v0 }
 0x35f   :  { %v590_v45 = vsel %vm311_vm1, %v584_v3, %v578_v1  ;;  %v580_v16 = vpop.permute.xlu1 %579  ;;  %v1469_v3 = vld [vmem:[%s2424_s10] ss:$0 sm:$0xff] }
 0x360   :  { %1649 = vmatmul.mubr.msk.bf16.gmra.mrb[16].mxu0 %vm318_vm2, %v590_v45 }
 0x361   :  { %1681 = vmatpush3.bf16.msra.mxu0 %v1771_v0  ;;  %v565_v8 = vpop.permute.xlu0 %564  ;;  %1652 = vmatprep.mubr.msk.bf16.mxu0 %vm1817_vm0, %v1816_v6 }
 0x362   :  { %1682 = vmatprep.subr.bf16.mxu0 %v1772_v5  ;;  %v586_v11 = vsel %vm304_vm15, %v2206_v2, %v565_v8 }
 0x363   :  { %v592_v19 = vsel %vm311_vm1, %v586_v11, %v580_v16 }
 0x365   :  { %1683 = vmatpush3.bf16.msra.mxu0 %v1772_v5 }
 0x366   :  { %1684 = vmatprep.subr.bf16.mxu0 %v1773_v9 }
 0x368   :  { %1653 = vmatmul.mubr.msk.bf16.gmra.mrb[20].mxu0 %vm318_vm2, %v592_v19 }
 0x369   :  { %1685 = vmatpush3.bf16.msra.mxu0 %v1773_v9 }
 0x36a   :  { %1686 = vmatprep.subr.bf16.mxu0 %v1774_v17  ;;  %v868_v2 = vpop.permute.xlu1 %867 }
 0x36b   :  { %v866_v22 = vpop.permute.xlu0 %865  ;;  %v883_v28 = vsel %vm304_vm15, %v2223_v44, %v868_v2 }
 0x36c   :  { %v881_v24 = vsel %vm304_vm15, %v2227_v48, %v866_v22 }
 0x36d   :  { %1687 = vmatpush3.bf16.msra.mxu0 %v1774_v17 }
 0x36e   :  { %1688 = vmatprep.subr.bf16.mxu0 %v1775_v20  ;;  %v879_v27 = vpop.permute.xlu1 %878 }
 0x36f   :  { %v877_v25 = vpop.permute.xlu0 %876  ;;  %v887_v29 = vsel %vm311_vm1, %v883_v28, %v879_v27 }
 0x370   :  { %v885_v26 = vsel %vm311_vm1, %v881_v24, %v877_v25 }
 0x371   :  { %1689 = vmatpush3.bf16.msra.mxu0 %v1775_v20  ;;  %1692 = vmatprep.mubr.msk.bf16.mxu0 %vm318_vm2, %v885_v26 }
 0x372   :  { %1690 = vmatprep.subr.bf16.mxu0 %v1776_v23 }
 0x375   :  { %1691 = vmatpush3.bf16.msra.mxu0 %v1776_v23 }
 0x376   :  { %1716 = vmatprep.subr.bf16.mxu0 %v1816_v6 }
 0x378   :  { %1693 = vmatmul.mubr.msk.bf16.vlgmr.msra.gmra.mrb[24].mxu0 %vm318_vm2, %v887_v29 }
 0x379   :  { %1724 = vmatprep.mubr.msk.bf16.mxu0 %vm1817_vm0, %v1816_v6 }
 0x37f   :  { %v1028_v5 = vpop.permute.xlu1 %1027 }
 0x380   :  { %v1023_v45 = vpop.permute.xlu0 %1022 }
 0x383   :  { %v1038_v29 = vpop.permute.xlu1 %1037 }
 0x384   :  { %v1033_v30 = vpop.permute.xlu0 %1032 }
 0x42b   :  { %v704_v38 = vpop.f32.mrb[12].mxu0 }
 0x42c   :  { %v705_v39 = vadd.f32 %v1453_v37, %v704_v38  ;;  %v1646_v41 = vpop.f32.mrb[13].mxu0 }
 0x42d   :  { %v707_v42 = vpop.f32.mrb[14].mxu0 }
 0x42e   :  { %v725_v44 = vmax.f32 %v705_v39, 0.0  ;;  %v708_v47 = vadd.f32 %v1453_v37, %v707_v42  ;;  %v1647_v48 = vpop.f32.mrb[15].mxu0 }
 0x430   :  { %v726_v49 = vmax.f32 %v708_v47, 0.0  ;;  %v729_v50 = vsel %vm304_vm15, %v725_v44, -inf  ;;  %v1784_v44 = vld [vmem:[%s2425_s11 + $0x38] sm:$0xff]  }
 0x431   :  { %1710 = vmatprep.subr.bf16.mxu1 %v1784_v44 }
 0x432   :  { %v730_v51 = vsel %vm304_vm15, %v726_v49, -inf  ;;  %1711 = vmatpush3.bf16.msra.mxu1 %v1784_v44 }
 0x433   :  { %v731_v52 = vmax.f32 %v729_v50, %v730_v51  ;;  %v712_v53 = vpop.f32.mrb[16].mxu0  ;;  %1728 = vmatprep.subr.bf16.mxu1 %v1816_v6 }
 0x434   :  { %v1650_v54 = vpop.f32.mrb[17].mxu0 }
 0x435   :  { %v714_v46 = vpop.f32.mrb[18].mxu0  ;;  %v732_v7 = vrot.slane %v731_v52, 4 }
 0x436   :  { %v1651_v55 = vpop.f32.mrb[19].mxu0  ;;  %v715_v4 = vadd.f32 %v1453_v37, %v714_v46 }
 0x437   :  { %v733_v13 = vmax.f32 %v731_v52, %v732_v7 }
 0x438   :  { %v727_v10 = vmax.f32 %v715_v4, 0.0 }
 0x439   :  { %v734_v59 = vrot.slane %v733_v13, 2 }
 0x43a   :  { %v738_v21 = vsel %vm304_vm15, %v727_v10, -inf }
 0x43b   :  { %v719_v56 = vpop.f32.mrb[20].mxu0  ;;  %v735_v62 = vmax.f32 %v733_v13, %v734_v59 }
 0x43c   :  { %v720_v57 = vadd.f32 %v1453_v37, %v719_v56  ;;  %v1654_v12 = vpop.f32.mrb[21].mxu0 }
 0x43d   :  { %v722_v14 = vpop.f32.mrb[22].mxu0  ;;  %v736_v43 = vrot.slane %v735_v62, 1 }
 0x43e   :  { %v728_v15 = vmax.f32 %v720_v57, 0.0  ;;  %v1655_v18 = vpop.f32.mrb[23].mxu0 }
 0x43f   :  { %v737_v20 = vmax.f32 %v735_v62, %v736_v43 }
 0x440   :  { %v739_v58 = vsel %vm304_vm15, %v728_v15, -inf }
 0x441   :  { %v740_v60 = vmax.f32 %v738_v21, %v739_v58 }
 0x443   :  { %v741_v61 = vrot.slane %v740_v60, 4 }
 0x445   :  { %v742_v63 = vmax.f32 %v740_v60, %v741_v61 }
 0x447   :  { %v743_v0 = vrot.slane %v742_v63, 2 }
 0x449   :  { %v744_v1 = vmax.f32 %v742_v63, %v743_v0 }
 0x44b   :  { %v745_v8 = vrot.slane %v744_v1, 1  ;;  %v1694_v9 = vpop.f32.mrb[24].mxu0 }
 0x44c   :  { %v1006_v11 = vadd.f32 %v1694_v9, %v1469_v3  ;;  %v997_v16 = vpop.f32.mrb[25].mxu0  ;;  %v1480_v9 = vld [vmem:[%s2426_s12] ss:$0 sm:$0xff] }
 0x44d   :  { %v998_v17 = vadd.f32 %v1469_v3, %v997_v16  ;;  %v1695_v19 = vpop.f32.mrb[26].mxu0  ;;  %v746_v22 = vmax.f32 %v744_v1, %v745_v8  ;;  %v1787_v8 = vld [vmem:[%s2427_s13 + $0x10] sm:$0xff]  }
 0x44e   :  { %v1014_v2 = vmax.f32 %v1006_v11, 0.0  ;;  %v1009_v23 = vadd.f32 %v1695_v19, %v1469_v3  ;;  %v1000_v24 = vpop.f32.mrb[27].mxu0 }
 0x44f   :  { %v1012_v25 = vmax.f32 %v998_v17, 0.0  ;;  %v1001_v26 = vadd.f32 %v1469_v3, %v1000_v24  ;;  %v2336_v27 = vsel %vm249_vm11, %v737_v20, %v746_v22 }
 0x450   :  { %v1015_v28 = vmax.f32 %v1009_v23, 0.0  ;;  %v1042_v32 = vmul.f32 %v1033_v30, %v1014_v2 }
 0x451   :  { %v1013_v31 = vmax.f32 %v1001_v26, 0.0  ;;  %v1040_v34 = vmul.f32 %v1023_v45, %v1012_v25  ;;  %v1786_v45 = vld [vmem:[%s2427_s13 + $0x8] sm:$0xff]  }
 0x452   :  { %v1043_v33 = vmul.f32 %v1038_v29, %v1015_v28 }
 0x453   :  { %v1041_v35 = vmul.f32 %v1028_v5, %v1013_v31  ;;  %v1785_v5 = vld [vmem:[%s2427_s13] sm:$0xff]  }
 0x454   :  { %v1045_v36 = vpack.c.bf16 %v1043_v33, %v1042_v32  ;;  %1717 = vmatpush3.bf16.msra.mxu0 %v1785_v5 }
 0x455   :  { %v1044_v37 = vpack.c.bf16 %v1041_v35, %v1040_v34  ;;  %1718 = vmatprep.subr.bf16.mxu0 %v1816_v6 }
 0x456   :  { %v1054_v38 = vshrl.u32 %v1045_v36, 16  ;;  %v1057_v42 = vshll.u32 %v1045_v36, 16  ;;  %v1788_v36 = vld [vmem:[%s2427_s13 + $0x18] sm:$0xff]  }
 0x457   :  { %v1047_v39 = vshrl.u32 %v1044_v37, 16  ;;  %v1050_v48 = vshll.u32 %v1044_v37, 16 }
 0x458   :  { %v1056_v41 = vrot.slane %v1054_v38, 7  ;;  %1719 = vmatpush3.bf16.msra.mxu0 %v1786_v45 }
 0x459   :  { %v1049_v47 = vrot.slane %v1047_v39, 7  ;;  %1720 = vmatprep.subr.bf16.mxu0 %v1816_v6 }
 0x45a   :  { %v1059_v49 = vor.u32 %v1057_v42, %v1056_v41  ;;  %v1064_v50 = vsel %vm2039_vm12, %v1056_v41, 0  ;;  %v1789_v42 = vld [vmem:[%s2429_s15] sm:$0xff]  }
 0x45b   :  { %v1052_v51 = vor.u32 %v1050_v48, %v1049_v47  ;;  %v1081_v46 = vshll.u32 %v1064_v50, 16  ;;  %v1094_v40 = vrot.slane %v1064_v50, 1 }
 0x45c   :  { %v1060_v52 = vsel %vm223_vm10, %v1049_v47, %v1059_v49  ;;  %1721 = vmatpush3.bf16.msra.mxu0 %v1787_v8 }
 0x45d   :  { %v1063_v53 = vsel %vm2039_vm12, 0, %v1052_v51  ;;  %v1073_v54 = vshll.u32 %v1060_v52, 16  ;;  %v1077_v7 = vshrl.u32 %v1060_v52, 16  ;;  %v1083_v12 = vrot.slane %v1081_v46, 1  ;;  %1722 = vmatprep.subr.bf16.mxu0 %v1816_v6 }
 0x45e   :  { %v1068_v55 = vshll.u32 %v1063_v53, 16  ;;  %v1066_v56 = vshrl.u32 %v1063_v53, 16  ;;  %v1092_v15 = vrot.slane %v1060_v52, 1  ;;  %v1091_v21 = vrot.slane %v1063_v53, 1 }
 0x45f   :  { %v1075_v4 = vrot.slane %v1073_v54, 1 }
 0x460   :  { %v1070_v10 = vrot.slane %v1068_v55, 1  ;;  %v1095_v58 = vsel %vm290_vm13, %v1092_v15, %v1094_v40  ;;  %v1093_v59 = vsel %vm290_vm13, %v1091_v21, %v1092_v15  ;;  %1723 = vmatpush3.bf16.msra.mxu0 %v1788_v36 }
 0x461   :  { %v1079_v57 = vor.u32 %v1077_v7, %v1075_v4 }
 0x462   :  { %v1071_v13 = vor.u32 %v1070_v10, %v1066_v56 }
 0x463   :  { %v1084_v14 = vsel %vm253_vm14, %v1079_v57, %v1083_v12 }
 0x464   :  { %1087 = vrot.lane.b32.xlu1 %v1084_v14, %s1820_s4  ;;  %v1076_v18 = vsel %vm253_vm14, %v1071_v13, %v1075_v4  ;;  %v1790_v4 = vld [vmem:[%s2429_s15 + $0x8] sm:$0xff]   ;;  %s1419_s15 = sshll.u32 %s1821_s28, 4  ;;  %s1420_s15 = int_to_ptr.vmem [resolvable:$true] %s1419_s15 }
 0x465   :  { %1085 = vrot.lane.b32.xlu0 %v1076_v18, %s1820_s4  ;;  %p1796_p1 = scmp.lt.s32.totalorder %s1420_s15, %s1420_s15 }
 0x468   :  { %1098 = vrot.lane.b32.xlu1 %v1095_v58, %s1819_s5 }
 0x469   :  { %1096 = vrot.lane.b32.xlu0 %v1093_v59, %s1819_s5 }
 0x4d6   :  { %v1088_v60 = vpop.permute.xlu1 %1087 }
 0x4d7   :  { %v1086_v61 = vpop.permute.xlu0 %1085  ;;  %v1103_v43 = vsel %vm304_vm15, %v1060_v52, %v1088_v60 }
 0x4d8   :  { %v1101_v63 = vsel %vm304_vm15, %v1063_v53, %v1086_v61 }
 0x4da   :  { %v1099_v62 = vpop.permute.xlu1 %1098 }
 0x4db   :  { %v1097_v0 = vpop.permute.xlu0 %1096  ;;  %v1107_v3 = vsel %vm311_vm1, %v1103_v43, %v1099_v62 }
 0x4dc   :  { %v1105_v1 = vsel %vm311_vm1, %v1101_v63, %v1097_v0 }
 0x4dd   :  { %1712 = vmatprep.mubr.msk.bf16.mxu1 %vm318_vm2, %v1105_v1 }
 0x4de   :  { %1713 = vmatmul.mubr.msk.bf16.vlgmr.msra.gmra.mrb[16].mxu1 %vm318_vm2, %v1107_v3 }
 0x4df   :  { %1732 = vmatprep.mubr.msk.bf16.mxu1 %vm1817_vm0, %v1816_v6  ;;  %vm1237_vm0 = vcmask 257024   ;;  %1729 = vmatpush3.bf16.msra.mxu1 %v1789_v42 }
 0x4e0   :  { %1730 = vmatprep.subr.bf16.mxu1 %v1816_v6  ;;  %v1491_v6 = vld [vmem:[%s2428_s14] ss:$0 sm:$0xff]  ;;  %s1791_s14 = scalar_lea.vmem %s1420_s15, 32 }
 0x4e1   :  { %p1792_p0 = scmp.ne.s32.totalorder %s1420_s15, %s1791_s14  ;;  %p1797_p2 = scmp.lt.s32.totalorder %s1791_s14, %s1791_s14 }
 0x4e3   :  { %1731 = vmatpush3.bf16.msra.mxu1 %v1790_v4  ;;  %p1798_p3 = por %p1797_p2, %p1796_p1 }
 0x4e5   :  { %p1799_p4 = pnand %p1798_p3, %p1792_p0 }
 0x5b1   :  { %v1714_v11 = vpop.f32.mrb[16].mxu1 }
 0x5b2   :  { %v1226_v16 = vadd.f32 %v1714_v11, %v1480_v9  ;;  %v1217_v17 = vpop.f32.mrb[17].mxu1 }
 0x5b3   :  { %v1218_v19 = vadd.f32 %v1480_v9, %v1217_v17  ;;  %v1715_v20 = vpop.f32.mrb[18].mxu1 }
 0x5b4   :  { %v1234_v22 = vmax.f32 %v1226_v16, 0.0  ;;  %v1229_v2 = vadd.f32 %v1715_v20, %v1480_v9  ;;  %v1220_v23 = vpop.f32.mrb[19].mxu1 }
 0x5b5   :  { %v1232_v24 = vmax.f32 %v1218_v19, 0.0  ;;  %v1221_v25 = vadd.f32 %v1480_v9, %v1220_v23 }
 0x5b6   :  { %v1235_v26 = vmax.f32 %v1229_v2, 0.0  ;;  %v1246_v29 = vsel %vm304_vm15, %v1234_v22, -inf }
 0x5b7   :  { %v1233_v28 = vmax.f32 %v1221_v25, 0.0  ;;  %v1236_v31 = vsel %vm304_vm15, %v1232_v24, -inf }
 0x5b8   :  { %v1247_v30 = vsel %vm1237_vm0, %v1235_v26, -inf }
 0x5b9   :  { %v1248_v32 = vmax.f32 %v1246_v29, %v1247_v30  ;;  %v1238_v33 = vsel %vm1237_vm0, %v1233_v28, -inf }
 0x5ba   :  { %v1239_v34 = vmax.f32 %v1236_v31, %v1238_v33 }
 0x5bb   :  { %v1249_v35 = vrot.slane %v1248_v32, 4 }
 0x5bc   :  { %v1240_v37 = vrot.slane %v1239_v34, 4 }
 0x5bd   :  { %v1250_v38 = vmax.f32 %v1248_v32, %v1249_v35 }
 0x5be   :  { %v1241_v39 = vmax.f32 %v1239_v34, %v1240_v37 }
 0x5bf   :  { %v1251_v41 = vrot.slane %v1250_v38, 2 }
 0x5c0   :  { %v1242_v44 = vrot.slane %v1241_v39, 2 }
 0x5c1   :  { %v1252_v47 = vmax.f32 %v1250_v38, %v1251_v41 }
 0x5c2   :  { %v1243_v48 = vmax.f32 %v1241_v39, %v1242_v44 }
 0x5c3   :  { %v1253_v49 = vrot.slane %v1252_v47, 1 }
 0x5c4   :  { %v1244_v50 = vrot.slane %v1243_v48, 1 }
 0x5c5   :  { %v1254_v51 = vmax.f32 %v1252_v47, %v1253_v49 }
 0x5c6   :  { %v1245_v52 = vmax.f32 %v1243_v48, %v1244_v50 }
 0x5c8   :  { %v1255_v53 = vsel %vm249_vm11, %v1245_v52, %v1254_v51 }
 0x5c9   :  { %1257 = vrot.lane.b32.xlu0 %v1255_v53, %s1820_s4 }
 0x63b   :  { %v1258_v54 = vpop.permute.xlu0 %1257 }
 0x63c   :  { %v1260_v46 = vsel %vm304_vm15, %v2336_v27, %v1258_v54  ;;  %v1497_v27 = vld [vmem:[%s2430_s16] ss:$0 sm:$0xff] }
 0x63d   :  { %v1261_v55 = vpack.c.bf16 %v1260_v46, %v1260_v46 }
 0x63f   :  { %1725 = vmatmul.mubr.msk.bf16.vlgmr.msra.gmra.mrb[28].mxu0 %vm311_vm1, %v1261_v55 }
 0x712   :  { %v1338_v7 = vpop.f32.mrb[28].mxu0 }
 0x713   :  { %v1339_v56 = vadd.f32 %v1491_v6, %v1338_v7  ;;  %v1726_v10 = vpop.f32.mrb[29].mxu0 }
 0x714   :  { %v1341_v57 = vpop.f32.mrb[30].mxu0 }
 0x715   :  { %v1344_v12 = vmax.f32 %v1339_v56, 0.0  ;;  %v1727_v13 = vpop.f32.mrb[31].mxu0 }
 0x717   :  { %v1345_v14 = vpack.c.bf16 %v1344_v12, %v1344_v12 }
 0x719   :  { %1733 = vmatmul.mubr.msk.bf16.vlgmr.msra.gmra.mrb[20].mxu1 %vm304_vm15, %v1345_v14 }
 0x7ec   :  { %v1406_v15 = vpop.f32.mrb[20].mxu1 }
 0x7ed   :  { %v1407_v18 = vadd.f32 %v1497_v27, %v1406_v15  ;;  %v1734_v21 = vpop.f32.mrb[21].mxu1 }
 0x7ee   :  { %v1409_v40 = vpop.f32.mrb[22].mxu1 }
 0x7ef   :  { %1412 = vst [vmem:[#allocation2] sm:$0x3] %v1407_v18  ;;  %v1735_v58 = vpop.f32.mrb[23].mxu1 }
 0x7f0   :  { %1802 = shalt.err (!%p1799_p4)
}
 0x7f1   :  { %s1803_s16 = scalar_lea.hbm %s2431_s17, 32 }
 0x7f2   :  { %p1804_p5 = scmp.ne.s32.totalorder %s2431_s17, %s1803_s16  ;;  %p1807_p6 = scmp.lt.u32.totalorder %s1803_s16, %s2431_s17 }
 0x7f4   :  { %p1809_p7 = pnand %p1807_p6, %p1804_p5 }
 0x7f6   :  { %1812 = shalt.err (!%p1809_p7)
}
 0x7f7   :  { %1422 = dma.vmem_to_hbm [thread:$0]  %s1420_s15, 32, %s2431_s17, [#allocation3]  }
 0x7f8   :  { %1813 = dma.done.wait [#allocation3], 32  }
 0x7f9   :  { %1814 = vsyncadd [#allocation3], 4294967264 }
 0x7fa   :  { %1426 = vsyncpa [#allocation3], 1 }

</bundles_post_ra>
